<compile_context>
chip_gen: v6e
topology: v6e:2x2x1
jax: 0.10.0
libtpu: 0.0.40
codegen_flags: <defaults>
</compile_context>

<pallas_src>
import functools
import math

import jax
import jax.numpy as jnp
from jax.experimental import pallas as pl
from jax.experimental.pallas import tpu as pltpu

LN_EPS = 1e-5
LANE = 128


# ---------------------------------------------------------------------------
# Small helpers
# ---------------------------------------------------------------------------
def _round_up(x, m):
    return ((x + m - 1) // m) * m


def _pad2(a, rows, cols):
    out = jnp.zeros((rows, cols), a.dtype)
    return out.at[: a.shape[0], : a.shape[1]].set(a)


def _slab(rows, width):
    """Pack small per-layer vectors into one (8, width) f32 slab (1 DMA)."""
    s = jnp.zeros((8, width), jnp.float32)
    for r, v in enumerate(rows):
        v = jnp.asarray(v, jnp.float32).reshape(-1)
        s = s.at[r, : v.shape[0]].set(v)
    return s


def _vmem_limit():
    # ~3/4 of physical VMEM, capped at 96 MiB (v5e/v6e: 128 MiB phys -> 96 MiB,
    # v7x: 64 MiB phys -> 48 MiB).  Falls back to 64 MiB if the query fails.
    try:
        cap = int(pltpu.get_tpu_info().vmem_capacity_bytes)
    except Exception:  # noqa: BLE001 - any failure -> conservative default
        cap = 0
    if cap <= 0:
        cap = 64 * 1024 * 1024
    return int(min(cap * 3 // 4, 96 * 1024 * 1024))


def _relu_ln(h, gamma, beta, hidden_valid):
    """ReLU then LayerNorm over the first `hidden_valid` lanes (rest are pad)."""
    h = jnp.maximum(h, 0.0)
    # TODO(synk): F.dropout(p=0.25) is eval-mode identity.
    lane = jax.lax.broadcasted_iota(jnp.int32, (1, h.shape[-1]), 1)
    mask = lane < hidden_valid
    inv_cnt = 1.0 / float(hidden_valid)
    mu = jnp.sum(h, axis=-1, keepdims=True) * inv_cnt       # padded lanes are 0
    c = jnp.where(mask, h - mu, 0.0)
    var = jnp.sum(c * c, axis=-1, keepdims=True) * inv_cnt
    return c * jax.lax.rsqrt(var + LN_EPS) * gamma + beta


def _masked_log_softmax(h, out_valid):
    lane = jax.lax.broadcasted_iota(jnp.int32, (1, h.shape[-1]), 1)
    mask = lane < out_valid
    z = jnp.where(mask, h, -1e30)
    m = jnp.max(z, axis=-1, keepdims=True)
    e = jnp.where(mask, jnp.exp(z - m), 0.0)
    return z - m - jnp.log(jnp.sum(e, axis=-1, keepdims=True))


# ---------------------------------------------------------------------------
# Kernels
# ---------------------------------------------------------------------------
def _xw0_kernel(x_ref, dinv_ref, w_ref, o_ref):
    """xW0 = (D^-1/2 * X) @ W0 for the first layer (row-tiled)."""
    xs = (dinv_ref[...] * x_ref[...]).astype(jnp.bfloat16)
    o_ref[...] = jnp.dot(xs, w_ref[...],
                         preferred_element_type=jnp.float32).astype(o_ref.dtype)


def _gcn_mid_kernel(adj_ref, xw_ref, dinv_ref, prm_ref, wnext_ref, o_ref,
                    acc_ref, *, hidden_valid):
    """One GCN layer (not last): stream A, accumulate A@xW, then the epilogue
    emits the NEXT layer's xW = (D^-1/2 * LN(relu(conv))) @ W_next."""
    k = pl.program_id(1)

    @pl.when(k == 0)
    def _():
        acc_ref[...] = jnp.zeros_like(acc_ref)

    acc_ref[...] += jnp.dot(adj_ref[...].astype(jnp.bfloat16), xw_ref[...],
                            preferred_element_type=jnp.float32)

    @pl.when(k == pl.num_programs(1) - 1)
    def _():
        h = dinv_ref[...] * acc_ref[...] + prm_ref[0:1, :]        # conv + bias
        h = _relu_ln(h, prm_ref[1:2, :], prm_ref[2:3, :], hidden_valid)
        xs = (dinv_ref[...] * h).astype(jnp.bfloat16)             # scale_out fused
        o_ref[...] = jnp.dot(xs, wnext_ref[...],
                             preferred_element_type=jnp.float32).astype(o_ref.dtype)


def _gcn_last_kernel(adj_ref, xw_ref, dinv_ref, prm_ref, pw0_ref, pw1_ref,
                     emb_ref, logp_ref, acc_ref, *, out_valid):
    """Last GCN layer fused with post-MLP + log_softmax (two outputs)."""
    k = pl.program_id(1)

    @pl.when(k == 0)
    def _():
        acc_ref[...] = jnp.zeros_like(acc_ref)

    acc_ref[...] += jnp.dot(adj_ref[...].astype(jnp.bfloat16), xw_ref[...],
                            preferred_element_type=jnp.float32)

    @pl.when(k == pl.num_programs(1) - 1)
    def _():
        fh = acc_ref.shape[-1]
        emb = dinv_ref[...] * acc_ref[...] + prm_ref[0:1, :fh]    # conv3 output
        emb_ref[...] = emb

        h = jnp.maximum(emb, 0.0)
        # TODO(synk): Dropout(0.25) ops (post-conv and inside post_mp) are
        # eval-mode identity.
        h = jnp.dot(h.astype(jnp.bfloat16), pw0_ref[...],
                    preferred_element_type=jnp.float32) + prm_ref[1:2, :fh]
        h = jnp.dot(h.astype(jnp.bfloat16), pw1_ref[...],
                    preferred_element_type=jnp.float32)
        h = h + prm_ref[2:3, : h.shape[-1]]
        logp_ref[...] = _masked_log_softmax(h, out_valid)


def _gnn_fused_kernel(adj_ref, x_ref, dinv_ref, w0_ref, w1_ref, w2_ref,
                      prm0_ref, prm1_ref, prm2_ref, pw0_ref, pw1_ref,
                      emb_ref, logp_ref, *, hidden_valid, out_valid):
    """Whole network in one call for small graphs (everything VMEM-resident)."""
    adj = adj_ref[...].astype(jnp.bfloat16)
    dinv = dinv_ref[...]
    fh = w0_ref.shape[-1]

    def conv(xw, prm_ref):
        h = dinv * jnp.dot(adj, xw, preferred_element_type=jnp.float32)
        return h + prm_ref[0:1, :fh]

    xw = jnp.dot((dinv * x_ref[...]).astype(jnp.bfloat16), w0_ref[...],
                 preferred_element_type=jnp.float32).astype(jnp.bfloat16)
    h = _relu_ln(conv(xw, prm0_ref), prm0_ref[1:2, :], prm0_ref[2:3, :],
                 hidden_valid)

    xw = jnp.dot((dinv * h).astype(jnp.bfloat16), w1_ref[...],
                 preferred_element_type=jnp.float32).astype(jnp.bfloat16)
    h = _relu_ln(conv(xw, prm1_ref), prm1_ref[1:2, :], prm1_ref[2:3, :],
                 hidden_valid)

    xw = jnp.dot((dinv * h).astype(jnp.bfloat16), w2_ref[...],
                 preferred_element_type=jnp.float32).astype(jnp.bfloat16)
    emb = conv(xw, prm2_ref)
    emb_ref[...] = emb

    h = jnp.maximum(emb, 0.0)
    # TODO(synk): Dropout(0.25) ops are eval-mode identity.
    h = jnp.dot(h.astype(jnp.bfloat16), pw0_ref[...],
                preferred_element_type=jnp.float32) + prm2_ref[1:2, :fh]
    h = jnp.dot(h.astype(jnp.bfloat16), pw1_ref[...],
                preferred_element_type=jnp.float32)
    h = h + prm2_ref[2:3, : h.shape[-1]]
    logp_ref[...] = _masked_log_softmax(h, out_valid)


# ---------------------------------------------------------------------------
# pallas_call wrappers
# ---------------------------------------------------------------------------
def _xw0(x_pad, dinv, w0, *, tm, vmem_limit):
    n_pad, fi = x_pad.shape
    fh = w0.shape[1]
    return pl.pallas_call(
        _xw0_kernel,
        out_shape=jax.ShapeDtypeStruct((n_pad, fh), jnp.bfloat16),
        grid=(n_pad // tm,),
        in_specs=[
            pl.BlockSpec((tm, fi), lambda i: (i, 0)),
            pl.BlockSpec((tm, 1), lambda i: (i, 0)),
            pl.BlockSpec((fi, fh), lambda i: (0, 0)),
        ],
        out_specs=pl.BlockSpec((tm, fh), lambda i: (i, 0)),
        compiler_params=pltpu.CompilerParams(
            dimension_semantics=("parallel",), vmem_limit_bytes=vmem_limit),
    )(x_pad, dinv, w0)


def _gcn_mid(adj, xw, dinv, prm, wnext, *, hidden_valid, tm, tk, vmem_limit):
    n_pad = adj.shape[0]
    fh = xw.shape[1]
    kernel = functools.partial(_gcn_mid_kernel, hidden_valid=hidden_valid)
    return pl.pallas_call(
        kernel,
        out_shape=jax.ShapeDtypeStruct((n_pad, fh), jnp.bfloat16),
        grid=(n_pad // tm, n_pad // tk),
        in_specs=[
            pl.BlockSpec((tm, tk), lambda i, k: (i, k)),      # A tile (int8)
            pl.BlockSpec((tk, fh), lambda i, k: (k, 0)),      # xW tile (bf16)
            pl.BlockSpec((tm, 1), lambda i, k: (i, 0)),       # D^-1/2 rows
            pl.BlockSpec(prm.shape, lambda i, k: (0, 0)),     # bias/gamma/beta
            pl.BlockSpec(wnext.shape, lambda i, k: (0, 0)),   # next-layer W
        ],
        out_specs=pl.BlockSpec((tm, fh), lambda i, k: (i, 0)),
        scratch_shapes=[pltpu.VMEM((tm, fh), jnp.float32)],
        compiler_params=pltpu.CompilerParams(
            dimension_semantics=("parallel", "arbitrary"),
            vmem_limit_bytes=vmem_limit),
    )(adj, xw, dinv, prm, wnext)


def _gcn_last(adj, xw, dinv, prm, pw0, pw1, *, out_valid, tm, tk, vmem_limit):
    n_pad = adj.shape[0]
    fh = xw.shape[1]
    fo = pw1.shape[1]
    kernel = functools.partial(_gcn_last_kernel, out_valid=out_valid)
    return pl.pallas_call(
        kernel,
        out_shape=(jax.ShapeDtypeStruct((n_pad, fh), jnp.float32),
                   jax.ShapeDtypeStruct((n_pad, fo), jnp.float32)),
        grid=(n_pad // tm, n_pad // tk),
        in_specs=[
            pl.BlockSpec((tm, tk), lambda i, k: (i, k)),
            pl.BlockSpec((tk, fh), lambda i, k: (k, 0)),
            pl.BlockSpec((tm, 1), lambda i, k: (i, 0)),
            pl.BlockSpec(prm.shape, lambda i, k: (0, 0)),
            pl.BlockSpec(pw0.shape, lambda i, k: (0, 0)),
            pl.BlockSpec(pw1.shape, lambda i, k: (0, 0)),
        ],
        out_specs=(pl.BlockSpec((tm, fh), lambda i, k: (i, 0)),
                   pl.BlockSpec((tm, fo), lambda i, k: (i, 0))),
        scratch_shapes=[pltpu.VMEM((tm, fh), jnp.float32)],
        compiler_params=pltpu.CompilerParams(
            dimension_semantics=("parallel", "arbitrary"),
            vmem_limit_bytes=vmem_limit),
    )(adj, xw, dinv, prm, pw0, pw1)


def _fused_small(adj, x_pad, dinv, w0, w1, w2, prm0, prm1, prm2, pw0, pw1,
                 *, hidden_valid, out_valid, vmem_limit):
    n_pad = adj.shape[0]
    fh = w0.shape[1]
    fo = pw1.shape[1]
    kernel = functools.partial(_gnn_fused_kernel, hidden_valid=hidden_valid,
                               out_valid=out_valid)
    # No grid: every operand is a single full VMEM block.
    return pl.pallas_call(
        kernel,
        out_shape=(jax.ShapeDtypeStruct((n_pad, fh), jnp.float32),
                   jax.ShapeDtypeStruct((n_pad, fo), jnp.float32)),
        compiler_params=pltpu.CompilerParams(vmem_limit_bytes=vmem_limit),
    )(adj, x_pad, dinv, w0, w1, w2, prm0, prm1, prm2, pw0, pw1)


# ---------------------------------------------------------------------------
# Parameters (PyTorch-shaped) and forward pass
# ---------------------------------------------------------------------------
def init_params(key, input_dim, hidden_dim, output_dim):
    ks = jax.random.split(key, 8)
    scale = 0.1

    def lin(k, din, dout):
        return (scale * jax.random.normal(k, (din, dout), jnp.float32),
                jnp.zeros((1, dout), jnp.float32))

    w0, b0 = lin(ks[0], input_dim, hidden_dim)
    w1, b1 = lin(ks[1], hidden_dim, hidden_dim)
    w2, b2 = lin(ks[2], hidden_dim, hidden_dim)
    g0 = jnp.ones((1, hidden_dim), jnp.float32)
    bt0 = jnp.zeros((1, hidden_dim), jnp.float32)
    g1 = jnp.ones((1, hidden_dim), jnp.float32)
    bt1 = jnp.zeros((1, hidden_dim), jnp.float32)
    pw0, pb0 = lin(ks[3], hidden_dim, hidden_dim)
    pw1, pb1 = lin(ks[4], hidden_dim, output_dim)
    return [w0, b0, w1, b1, w2, b2, g0, bt0, g1, bt1, pw0, pb0, pw1, pb1]


def gnnstack_forward(x, edge_index, batch, params, hidden_dim, output_dim,
                     *, tm=256, tk=512, fuse_max_nodes=2048, force_tiled=False):
    del batch  # task='node': global_add_pool not applied
    (w0, b0, w1, b1, w2, b2, g0, bt0, g1, bt1, pw0, pb0, pw1, pb1) = params
    N, input_dim = x.shape

    fi = _round_up(input_dim, LANE)
    fh = _round_up(hidden_dim, LANE)
    fo = _round_up(output_dim, LANE)
    fw = max(fh, fo)

    use_fused = (not force_tiled) and (_round_up(N, LANE) <= fuse_max_nodes)
    if use_fused:
        n_pad = _round_up(max(N, LANE), LANE)
    else:
        step = tm * tk // math.gcd(tm, tk)
        n_pad = _round_up(max(N, step), step)

    # Dense adjacency with self loops, built directly in int8 (0/1 exact).
    # TODO(synk): duplicate edges are deduplicated by .set(); PyG GCNConv would
    #             count multiplicities (and would stack pre-existing self loops).
    adj = jnp.zeros((n_pad, n_pad), jnp.int8)
    adj = adj.at[edge_index[1], edge_index[0]].set(1)
    adj = adj.at[jnp.arange(N), jnp.arange(N)].set(1)
    deg = jnp.sum(adj, axis=1, dtype=jnp.float32, keepdims=True)
    dinv = jnp.where(deg > 0.0, jax.lax.rsqrt(jnp.maximum(deg, 1.0)), 0.0)

    # Lane-padded bf16 weights for the MXU.
    w0p = _pad2(w0, fi, fh).astype(jnp.bfloat16)
    w1p = _pad2(w1, fh, fh).astype(jnp.bfloat16)
    w2p = _pad2(w2, fh, fh).astype(jnp.bfloat16)
    pw0p = _pad2(pw0, fh, fh).astype(jnp.bfloat16)
    pw1p = _pad2(pw1, fh, fo).astype(jnp.bfloat16)

    prm0 = _slab([b0, g0, bt0], fh)        # bias / LN gamma / LN beta (layer 0)
    prm1 = _slab([b1, g1, bt1], fh)        # bias / LN gamma / LN beta (layer 1)
    prm2 = _slab([b2, pb0, pb1], fw)       # bias (layer 2) / post-MLP biases

    x_pad = _pad2(x.astype(jnp.float32), n_pad, fi)
    vmem_limit = _vmem_limit()

    if use_fused:
        emb_pad, logp_pad = _fused_small(
            adj, x_pad, dinv, w0p, w1p, w2p, prm0, prm1, prm2, pw0p, pw1p,
            hidden_valid=hidden_dim, out_valid=output_dim,
            vmem_limit=vmem_limit)
    else:
        xw0 = _xw0(x_pad, dinv, w0p, tm=tm, vmem_limit=vmem_limit)
        xw1 = _gcn_mid(adj, xw0, dinv, prm0, w1p, hidden_valid=hidden_dim,
                       tm=tm, tk=tk, vmem_limit=vmem_limit)
        xw2 = _gcn_mid(adj, xw1, dinv, prm1, w2p, hidden_valid=hidden_dim,
                       tm=tm, tk=tk, vmem_limit=vmem_limit)
        emb_pad, logp_pad = _gcn_last(adj, xw2, dinv, prm2, pw0p, pw1p,
                                      out_valid=output_dim, tm=tm, tk=tk,
                                      vmem_limit=vmem_limit)

    return emb_pad[:N, :hidden_dim], logp_pad[:N, :output_dim]


if __name__ == "__main__":
    key = jax.random.PRNGKey(0)
    k_x, k_e, k_p, k_x2, k_e2 = jax.random.split(key, 5)

    input_dim, hidden_dim, output_dim = 16, 32, 8
    params = init_params(k_p, input_dim, hidden_dim, output_dim)

    # --- Small graph -> fully fused single-pallas_call path -----------------
    N1, E1 = 16, 40
    x1 = jax.random.normal(k_x, (N1, input_dim), jnp.float32)
    ei1 = jax.random.randint(k_e, (2, E1), 0, N1, dtype=jnp.int32)
    batch1 = jnp.zeros((N1,), jnp.int32)     # single graph; unused (task='node')

    emb1, logp1 = gnnstack_forward(x1, ei1, batch1, params,
                                   hidden_dim, output_dim)
    emb1 = jax.block_until_ready(emb1)
    logp1 = jax.block_until_ready(logp1)
    assert emb1.shape == (N1, hidden_dim)
    assert logp1.shape == (N1, output_dim)
    assert jnp.allclose(jnp.sum(jnp.exp(logp1), axis=1), 1.0, atol=1e-4)

    # --- Larger graph forced through the K-tiled streaming path (grid 3x3) --
    N2, E2 = 300, 1200
    x2 = jax.random.normal(k_x2, (N2, input_dim), jnp.float32)
    ei2 = jax.random.randint(k_e2, (2, E2), 0, N2, dtype=jnp.int32)
    batch2 = jnp.zeros((N2,), jnp.int32)

    emb2t, logp2t = gnnstack_forward(x2, ei2, batch2, params, hidden_dim,
                                     output_dim, tm=128, tk=128,
                                     force_tiled=True)
    emb2f, logp2f = gnnstack_forward(x2, ei2, batch2, params, hidden_dim,
                                     output_dim)                 # fused reference
    logp2t = jax.block_until_ready(logp2t)
    assert emb2t.shape == (N2, hidden_dim)
    assert logp2t.shape == (N2, output_dim)
    assert jnp.allclose(jnp.sum(jnp.exp(logp2t), axis=1), 1.0, atol=1e-4)
    # Both code paths should agree to well within bf16 noise.
    assert float(jnp.max(jnp.abs(logp2t - logp2f))) < 5e-2
    assert float(jnp.max(jnp.abs(emb2t - emb2f))) < 5e-2

    print("KERNEL_OK")
</pallas_src>

<mosaic_0001>
module attributes {stable_mosaic.version = 11 : i64} {
  func.func @_gnn_fused_kernel(%arg0: memref<128x128xi8, #tpu.memory_space<vmem>>, %arg1: memref<128x128xf32, #tpu.memory_space<vmem>>, %arg2: memref<128x1xf32, #tpu.memory_space<vmem>>, %arg3: memref<128x128xbf16, #tpu.memory_space<vmem>>, %arg4: memref<128x128xbf16, #tpu.memory_space<vmem>>, %arg5: memref<128x128xbf16, #tpu.memory_space<vmem>>, %arg6: memref<8x128xf32, #tpu.memory_space<vmem>>, %arg7: memref<8x128xf32, #tpu.memory_space<vmem>>, %arg8: memref<8x128xf32, #tpu.memory_space<vmem>>, %arg9: memref<128x128xbf16, #tpu.memory_space<vmem>>, %arg10: memref<128x128xbf16, #tpu.memory_space<vmem>>, %arg11: memref<128x128xf32, #tpu.memory_space<vmem>>, %arg12: memref<128x128xf32, #tpu.memory_space<vmem>>) attributes {dimension_semantics = [], scalar_prefetch = 0 : i64, scratch_operands = 0 : i64, tpu.core_type = #tpu.core_type<tc>} {
    %c0 = arith.constant 0 : index
    %c0_0 = arith.constant 0 : index
    %0 = vector.load %arg0[%c0, %c0_0] : memref<128x128xi8, #tpu.memory_space<vmem>>, vector<128x128xi8>
    %1 = arith.sitofp %0 : vector<128x128xi8> to vector<128x128xbf16>
    %c0_1 = arith.constant 0 : index
    %c0_2 = arith.constant 0 : index
    %2 = vector.load %arg2[%c0_1, %c0_2] : memref<128x1xf32, #tpu.memory_space<vmem>>, vector<128x1xf32>
    %c0_3 = arith.constant 0 : index
    %c0_4 = arith.constant 0 : index
    %3 = vector.load %arg1[%c0_3, %c0_4] : memref<128x128xf32, #tpu.memory_space<vmem>>, vector<128x128xf32>
    %4 = vector.broadcast %2 : vector<128x1xf32> to vector<128x128xf32>
    %5 = arith.mulf %4, %3 : vector<128x128xf32>
    %6 = arith.truncf %5 : vector<128x128xf32> to vector<128x128xbf16>
    %c0_5 = arith.constant 0 : index
    %c0_6 = arith.constant 0 : index
    %7 = vector.load %arg3[%c0_5, %c0_6] : memref<128x128xbf16, #tpu.memory_space<vmem>>, vector<128x128xbf16>
    %cst = arith.constant dense<0.000000e+00> : vector<128x128xf32>
    %8 = tpu.matmul %6, %7, %cst {dimension_numbers = #tpu.dot_dimension_numbers<[1], [0], [0], [1], [0, 0, 1, 1], [], []>} : vector<128x128xbf16>, vector<128x128xbf16>, vector<128x128xf32> -> vector<128x128xf32>
    %9 = arith.truncf %8 : vector<128x128xf32> to vector<128x128xbf16>
    %cst_7 = arith.constant dense<0.000000e+00> : vector<128x128xf32>
    %10 = tpu.matmul %1, %9, %cst_7 {dimension_numbers = #tpu.dot_dimension_numbers<[1], [0], [0], [1], [0, 0, 1, 1], [], []>} : vector<128x128xbf16>, vector<128x128xbf16>, vector<128x128xf32> -> vector<128x128xf32>
    %11 = vector.broadcast %2 : vector<128x1xf32> to vector<128x128xf32>
    %12 = arith.mulf %11, %10 : vector<128x128xf32>
    %c0_8 = arith.constant 0 : index
    %c0_9 = arith.constant 0 : index
    %13 = vector.load %arg6[%c0_8, %c0_9] : memref<8x128xf32, #tpu.memory_space<vmem>>, vector<1x128xf32>
    %14 = vector.broadcast %13 : vector<1x128xf32> to vector<128x128xf32>
    %15 = arith.addf %12, %14 : vector<128x128xf32>
    %c1 = arith.constant 1 : index
    %c0_10 = arith.constant 0 : index
    %16 = vector.load %arg6[%c1, %c0_10] : memref<8x128xf32, #tpu.memory_space<vmem>>, vector<1x128xf32>
    %c2 = arith.constant 2 : index
    %c0_11 = arith.constant 0 : index
    %17 = vector.load %arg6[%c2, %c0_11] : memref<8x128xf32, #tpu.memory_space<vmem>>, vector<1x128xf32>
    %cst_12 = arith.constant 0.000000e+00 : f32
    %18 = vector.broadcast %cst_12 : f32 to vector<128x128xf32>
    %19 = arith.maximumf %15, %18 : vector<128x128xf32>
    %20 = tpu.iota {dimensions = array<i32: 1>} : vector<1x128xi32>
    %c32_i32 = arith.constant 32 : i32
    %21 = vector.broadcast %c32_i32 : i32 to vector<1x128xi32>
    %22 = arith.cmpi slt, %20, %21 : vector<1x128xi32>
    %cst_13 = arith.constant dense<0.000000e+00> : vector<128xf32>
    %23 = vector.multi_reduction <add>, %19, %cst_13 [1] : vector<128x128xf32> to vector<128xf32>
    %24 = vector.shape_cast %23 : vector<128xf32> to vector<128x1xf32>
    %cst_14 = arith.constant 3.125000e-02 : f32
    %25 = vector.broadcast %cst_14 : f32 to vector<128x1xf32>
    %26 = arith.mulf %24, %25 : vector<128x1xf32>
    %27 = vector.broadcast %26 : vector<128x1xf32> to vector<128x128xf32>
    %28 = arith.subf %19, %27 : vector<128x128xf32>
    %cst_15 = arith.constant 0.000000e+00 : f32
    %29 = vector.shape_cast %22 : vector<1x128xi1> to vector<1x128xi1>
    %30 = vector.broadcast %29 : vector<1x128xi1> to vector<128x128xi1>
    %31 = vector.broadcast %cst_15 : f32 to vector<128x128xf32>
    %32 = arith.select %30, %28, %31 : vector<128x128xi1>, vector<128x128xf32>
    %33 = arith.mulf %32, %32 : vector<128x128xf32>
    %cst_16 = arith.constant dense<0.000000e+00> : vector<128xf32>
    %34 = vector.multi_reduction <add>, %33, %cst_16 [1] : vector<128x128xf32> to vector<128xf32>
    %35 = vector.shape_cast %34 : vector<128xf32> to vector<128x1xf32>
    %cst_17 = arith.constant 3.125000e-02 : f32
    %36 = vector.broadcast %cst_17 : f32 to vector<128x1xf32>
    %37 = arith.mulf %35, %36 : vector<128x1xf32>
    %cst_18 = arith.constant 9.99999974E-6 : f32
    %38 = vector.broadcast %cst_18 : f32 to vector<128x1xf32>
    %39 = arith.addf %37, %38 : vector<128x1xf32>
    %40 = math.rsqrt %39 : vector<128x1xf32>
    %41 = vector.broadcast %40 : vector<128x1xf32> to vector<128x128xf32>
    %42 = arith.mulf %32, %41 : vector<128x128xf32>
    %43 = vector.broadcast %16 : vector<1x128xf32> to vector<128x128xf32>
    %44 = arith.mulf %42, %43 : vector<128x128xf32>
    %45 = vector.broadcast %17 : vector<1x128xf32> to vector<128x128xf32>
    %46 = arith.addf %44, %45 : vector<128x128xf32>
    %47 = vector.broadcast %2 : vector<128x1xf32> to vector<128x128xf32>
    %48 = arith.mulf %47, %46 : vector<128x128xf32>
    %49 = arith.truncf %48 : vector<128x128xf32> to vector<128x128xbf16>
    %c0_19 = arith.constant 0 : index
    %c0_20 = arith.constant 0 : index
    %50 = vector.load %arg4[%c0_19, %c0_20] : memref<128x128xbf16, #tpu.memory_space<vmem>>, vector<128x128xbf16>
    %cst_21 = arith.constant dense<0.000000e+00> : vector<128x128xf32>
    %51 = tpu.matmul %49, %50, %cst_21 {dimension_numbers = #tpu.dot_dimension_numbers<[1], [0], [0], [1], [0, 0, 1, 1], [], []>} : vector<128x128xbf16>, vector<128x128xbf16>, vector<128x128xf32> -> vector<128x128xf32>
    %52 = arith.truncf %51 : vector<128x128xf32> to vector<128x128xbf16>
    %cst_22 = arith.constant dense<0.000000e+00> : vector<128x128xf32>
    %53 = tpu.matmul %1, %52, %cst_22 {dimension_numbers = #tpu.dot_dimension_numbers<[1], [0], [0], [1], [0, 0, 1, 1], [], []>} : vector<128x128xbf16>, vector<128x128xbf16>, vector<128x128xf32> -> vector<128x128xf32>
    %54 = vector.broadcast %2 : vector<128x1xf32> to vector<128x128xf32>
    %55 = arith.mulf %54, %53 : vector<128x128xf32>
    %c0_23 = arith.constant 0 : index
    %c0_24 = arith.constant 0 : index
    %56 = vector.load %arg7[%c0_23, %c0_24] : memref<8x128xf32, #tpu.memory_space<vmem>>, vector<1x128xf32>
    %57 = vector.broadcast %56 : vector<1x128xf32> to vector<128x128xf32>
    %58 = arith.addf %55, %57 : vector<128x128xf32>
    %c1_25 = arith.constant 1 : index
    %c0_26 = arith.constant 0 : index
    %59 = vector.load %arg7[%c1_25, %c0_26] : memref<8x128xf32, #tpu.memory_space<vmem>>, vector<1x128xf32>
    %c2_27 = arith.constant 2 : index
    %c0_28 = arith.constant 0 : index
    %60 = vector.load %arg7[%c2_27, %c0_28] : memref<8x128xf32, #tpu.memory_space<vmem>>, vector<1x128xf32>
    %cst_29 = arith.constant 0.000000e+00 : f32
    %61 = vector.broadcast %cst_29 : f32 to vector<128x128xf32>
    %62 = arith.maximumf %58, %61 : vector<128x128xf32>
    %63 = tpu.iota {dimensions = array<i32: 1>} : vector<1x128xi32>
    %c32_i32_30 = arith.constant 32 : i32
    %64 = vector.broadcast %c32_i32_30 : i32 to vector<1x128xi32>
    %65 = arith.cmpi slt, %63, %64 : vector<1x128xi32>
    %cst_31 = arith.constant dense<0.000000e+00> : vector<128xf32>
    %66 = vector.multi_reduction <add>, %62, %cst_31 [1] : vector<128x128xf32> to vector<128xf32>
    %67 = vector.shape_cast %66 : vector<128xf32> to vector<128x1xf32>
    %cst_32 = arith.constant 3.125000e-02 : f32
    %68 = vector.broadcast %cst_32 : f32 to vector<128x1xf32>
    %69 = arith.mulf %67, %68 : vector<128x1xf32>
    %70 = vector.broadcast %69 : vector<128x1xf32> to vector<128x128xf32>
    %71 = arith.subf %62, %70 : vector<128x128xf32>
    %cst_33 = arith.constant 0.000000e+00 : f32
    %72 = vector.shape_cast %65 : vector<1x128xi1> to vector<1x128xi1>
    %73 = vector.broadcast %72 : vector<1x128xi1> to vector<128x128xi1>
    %74 = vector.broadcast %cst_33 : f32 to vector<128x128xf32>
    %75 = arith.select %73, %71, %74 : vector<128x128xi1>, vector<128x128xf32>
    %76 = arith.mulf %75, %75 : vector<128x128xf32>
    %cst_34 = arith.constant dense<0.000000e+00> : vector<128xf32>
    %77 = vector.multi_reduction <add>, %76, %cst_34 [1] : vector<128x128xf32> to vector<128xf32>
    %78 = vector.shape_cast %77 : vector<128xf32> to vector<128x1xf32>
    %cst_35 = arith.constant 3.125000e-02 : f32
    %79 = vector.broadcast %cst_35 : f32 to vector<128x1xf32>
    %80 = arith.mulf %78, %79 : vector<128x1xf32>
    %cst_36 = arith.constant 9.99999974E-6 : f32
    %81 = vector.broadcast %cst_36 : f32 to vector<128x1xf32>
    %82 = arith.addf %80, %81 : vector<128x1xf32>
    %83 = math.rsqrt %82 : vector<128x1xf32>
    %84 = vector.broadcast %83 : vector<128x1xf32> to vector<128x128xf32>
    %85 = arith.mulf %75, %84 : vector<128x128xf32>
    %86 = vector.broadcast %59 : vector<1x128xf32> to vector<128x128xf32>
    %87 = arith.mulf %85, %86 : vector<128x128xf32>
    %88 = vector.broadcast %60 : vector<1x128xf32> to vector<128x128xf32>
    %89 = arith.addf %87, %88 : vector<128x128xf32>
    %90 = vector.broadcast %2 : vector<128x1xf32> to vector<128x128xf32>
    %91 = arith.mulf %90, %89 : vector<128x128xf32>
    %92 = arith.truncf %91 : vector<128x128xf32> to vector<128x128xbf16>
    %c0_37 = arith.constant 0 : index
    %c0_38 = arith.constant 0 : index
    %93 = vector.load %arg5[%c0_37, %c0_38] : memref<128x128xbf16, #tpu.memory_space<vmem>>, vector<128x128xbf16>
    %cst_39 = arith.constant dense<0.000000e+00> : vector<128x128xf32>
    %94 = tpu.matmul %92, %93, %cst_39 {dimension_numbers = #tpu.dot_dimension_numbers<[1], [0], [0], [1], [0, 0, 1, 1], [], []>} : vector<128x128xbf16>, vector<128x128xbf16>, vector<128x128xf32> -> vector<128x128xf32>
    %95 = arith.truncf %94 : vector<128x128xf32> to vector<128x128xbf16>
    %cst_40 = arith.constant dense<0.000000e+00> : vector<128x128xf32>
    %96 = tpu.matmul %1, %95, %cst_40 {dimension_numbers = #tpu.dot_dimension_numbers<[1], [0], [0], [1], [0, 0, 1, 1], [], []>} : vector<128x128xbf16>, vector<128x128xbf16>, vector<128x128xf32> -> vector<128x128xf32>
    %97 = vector.broadcast %2 : vector<128x1xf32> to vector<128x128xf32>
    %98 = arith.mulf %97, %96 : vector<128x128xf32>
    %c0_41 = arith.constant 0 : index
    %c0_42 = arith.constant 0 : index
    %99 = vector.load %arg8[%c0_41, %c0_42] : memref<8x128xf32, #tpu.memory_space<vmem>>, vector<1x128xf32>
    %100 = vector.broadcast %99 : vector<1x128xf32> to vector<128x128xf32>
    %101 = arith.addf %98, %100 : vector<128x128xf32>
    %c0_43 = arith.constant 0 : index
    %c0_44 = arith.constant 0 : index
    %102 = vector.load %arg11[%c0_43, %c0_44] : memref<128x128xf32, #tpu.memory_space<vmem>>, vector<128x128xf32>
    tpu.vector_store %arg11[%c0_43, %c0_44], %101 {strides = array<i32>} : memref<128x128xf32, #tpu.memory_space<vmem>>, vector<128x128xf32>,
    %cst_45 = arith.constant 0.000000e+00 : f32
    %103 = vector.broadcast %cst_45 : f32 to vector<128x128xf32>
    %104 = arith.maximumf %101, %103 : vector<128x128xf32>
    %105 = arith.truncf %104 : vector<128x128xf32> to vector<128x128xbf16>
    %c0_46 = arith.constant 0 : index
    %c0_47 = arith.constant 0 : index
    %106 = vector.load %arg9[%c0_46, %c0_47] : memref<128x128xbf16, #tpu.memory_space<vmem>>, vector<128x128xbf16>
    %cst_48 = arith.constant dense<0.000000e+00> : vector<128x128xf32>
    %107 = tpu.matmul %105, %106, %cst_48 {dimension_numbers = #tpu.dot_dimension_numbers<[1], [0], [0], [1], [0, 0, 1, 1], [], []>} : vector<128x128xbf16>, vector<128x128xbf16>, vector<128x128xf32> -> vector<128x128xf32>
    %c1_49 = arith.constant 1 : index
    %c0_50 = arith.constant 0 : index
    %108 = vector.load %arg8[%c1_49, %c0_50] : memref<8x128xf32, #tpu.memory_space<vmem>>, vector<1x128xf32>
    %109 = vector.broadcast %108 : vector<1x128xf32> to vector<128x128xf32>
    %110 = arith.addf %107, %109 : vector<128x128xf32>
    %111 = arith.truncf %110 : vector<128x128xf32> to vector<128x128xbf16>
    %c0_51 = arith.constant 0 : index
    %c0_52 = arith.constant 0 : index
    %112 = vector.load %arg10[%c0_51, %c0_52] : memref<128x128xbf16, #tpu.memory_space<vmem>>, vector<128x128xbf16>
    %cst_53 = arith.constant dense<0.000000e+00> : vector<128x128xf32>
    %113 = tpu.matmul %111, %112, %cst_53 {dimension_numbers = #tpu.dot_dimension_numbers<[1], [0], [0], [1], [0, 0, 1, 1], [], []>} : vector<128x128xbf16>, vector<128x128xbf16>, vector<128x128xf32> -> vector<128x128xf32>
    %c2_54 = arith.constant 2 : index
    %c0_55 = arith.constant 0 : index
    %114 = vector.load %arg8[%c2_54, %c0_55] : memref<8x128xf32, #tpu.memory_space<vmem>>, vector<1x128xf32>
    %115 = vector.broadcast %114 : vector<1x128xf32> to vector<128x128xf32>
    %116 = arith.addf %113, %115 : vector<128x128xf32>
    %117 = tpu.iota {dimensions = array<i32: 1>} : vector<1x128xi32>
    %c8_i32 = arith.constant 8 : i32
    %118 = vector.broadcast %c8_i32 : i32 to vector<1x128xi32>
    %119 = arith.cmpi slt, %117, %118 : vector<1x128xi32>
    %cst_56 = arith.constant -1.000000e+30 : f32
    %120 = vector.shape_cast %119 : vector<1x128xi1> to vector<1x128xi1>
    %121 = vector.broadcast %120 : vector<1x128xi1> to vector<128x128xi1>
    %122 = vector.broadcast %cst_56 : f32 to vector<128x128xf32>
    %123 = arith.select %121, %116, %122 : vector<128x128xi1>, vector<128x128xf32>
    %cst_57 = arith.constant dense<0xFF800000> : vector<128xf32>
    %124 = vector.multi_reduction <maximumf>, %123, %cst_57 [1] : vector<128x128xf32> to vector<128xf32>
    %125 = vector.shape_cast %124 : vector<128xf32> to vector<128x1xf32>
    %126 = vector.broadcast %125 : vector<128x1xf32> to vector<128x128xf32>
    %127 = arith.subf %123, %126 : vector<128x128xf32>
    %128 = math.exp %127 : vector<128x128xf32>
    %cst_58 = arith.constant 0.000000e+00 : f32
    %129 = vector.shape_cast %119 : vector<1x128xi1> to vector<1x128xi1>
    %130 = vector.broadcast %129 : vector<1x128xi1> to vector<128x128xi1>
    %131 = vector.broadcast %cst_58 : f32 to vector<128x128xf32>
    %132 = arith.select %130, %128, %131 : vector<128x128xi1>, vector<128x128xf32>
    %133 = vector.broadcast %125 : vector<128x1xf32> to vector<128x128xf32>
    %134 = arith.subf %123, %133 : vector<128x128xf32>
    %cst_59 = arith.constant dense<0.000000e+00> : vector<128xf32>
    %135 = vector.multi_reduction <add>, %132, %cst_59 [1] : vector<128x128xf32> to vector<128xf32>
    %136 = vector.shape_cast %135 : vector<128xf32> to vector<128x1xf32>
    %137 = math.log %136 : vector<128x1xf32>
    %138 = vector.broadcast %137 : vector<128x1xf32> to vector<128x128xf32>
    %139 = arith.subf %134, %138 : vector<128x128xf32>
    %c0_60 = arith.constant 0 : index
    %c0_61 = arith.constant 0 : index
    %140 = vector.load %arg12[%c0_60, %c0_61] : memref<128x128xf32, #tpu.memory_space<vmem>>, vector<128x128xf32>
    tpu.vector_store %arg12[%c0_60, %c0_61], %139 {strides = array<i32>} : memref<128x128xf32, #tpu.memory_space<vmem>>, vector<128x128xf32>,
    return
  }
}

</mosaic_0001>

<bundles_post_ra>
// kernel: tpu_custom_call.1
= control target key start
LH: loop header
LB: loop body
LE: loop exit
PB: predicated region body
PF: predicated region fallthrough
CT: control target
= control target key end

     0   :  { %18 = vsyncpa [#allocation3], 0  ;;  %s4351_s0 = inlined_call_operand.hbm [shape: s8[128,128], index: 0, kind: input, shape index: {}]   ;;  %s4352_s1 = inlined_call_operand.vmem [shape: f32[128,128], index: 1, kind: input, shape index: {}]   ;;  %s4353_s2 = inlined_call_operand.vmem [shape: f32[128,1], index: 2, kind: input, shape index: {}]   ;;  %s4354_s3 = inlined_call_operand.hbm [shape: bf16[128,128], index: 3, kind: input, shape index: {}]   ;;  %s4355_s4 = inlined_call_operand.hbm [shape: bf16[128,128], index: 4, kind: input, shape index: {}]   ;;  %s4356_s5 = inlined_call_operand.hbm [shape: bf16[128,128], index: 5, kind: input, shape index: {}]   ;;  %s4357_s6 = inlined_call_operand.vmem [shape: f32[8,128], index: 6, kind: input, shape index: {}]   ;;  %s4358_s7 = inlined_call_operand.hbm [shape: f32[8,128], index: 7, kind: input, shape index: {}]   ;;  %s4359_s8 = inlined_call_operand.hbm [shape: f32[8,128], index: 8, kind: input, shape index: {}]   ;;  %s4360_s9 = inlined_call_operand.hbm [shape: bf16[128,128], index: 9, kind: input, shape index: {}]   ;;  %s4361_s10 = inlined_call_operand.hbm [shape: bf16[128,128], index: 10, kind: input, shape index: {}]   ;;  %s4362_s11 = inlined_call_operand.hbm [shape: f32[128,128], index: 11, kind: output, shape index: {0}]   ;;  %s4363_s12 = inlined_call_operand.hbm [shape: f32[128,128], index: 12, kind: output, shape index: {1}]  }
   0x1   :  { %19 = vsyncpa [#allocation6], 0 }
   0x2   :  { %20 = vsyncpa [#allocation9], 0 }
   0x3   :  { %21 = vsyncpa [#allocation12], 0 }
   0x4   :  { %22 = vsyncpa [#allocation15], 0 }
   0x5   :  { %23 = vsyncpa [#allocation4], 0 }
   0x6   :  { %24 = vsyncpa [#allocation18], 0  ;;  %s3218_s21 = smov [#allocation5]  }
   0x7   :  { %s46_s22 = sshll.u32 %s3218_s21, 4  ;;  %s47_s22 = int_to_ptr.vmem [resolvable:$true] %s46_s22 }
   0x8   :  { %s3012_s23 = scalar_lea.vmem %s47_s22, 1024  ;;  %p3017_p1 = scmp.lt.s32.totalorder %s47_s22, %s47_s22 }
   0x9   :  { %p3013_p0 = scmp.ne.s32.totalorder %s47_s22, %s3012_s23  ;;  %p3018_p2 = scmp.lt.s32.totalorder %s3012_s23, %s3012_s23 }
   0xb   :  { %p3019_p3 = por %p3018_p2, %p3017_p1 }
   0xd   :  { %p3020_p4 = pnand %p3019_p3, %p3013_p0 }
   0xf   :  { %3023 = shalt.err (!%p3020_p4)
}
  0x10   :  { %s3219_s24 = smov 64   ;;  %s3220_s25 = smov 4  }
  0x11   :  { %52 = dma.hbm_to_vmem [thread:$0]  %s4354_s3, 1024, %s47_s22, [#allocation6], %s3219_s24, %s3219_s24, %s3220_s25  }
  0x12   :  { %s3221_s28 = smov [#allocation8]   ;;  %s3222_s30 = smov [#allocation11]  }
  0x13   :  { %s70_s29 = sshll.u32 %s3221_s28, 4  ;;  %s95_s13 = sshll.u32 %s3222_s30, 4  ;;  %s71_s29 = int_to_ptr.vmem [resolvable:$true] %s70_s29  ;;  %s96_s13 = int_to_ptr.vmem [resolvable:$true] %s95_s13 }
  0x14   :  { %s3032_s14 = scalar_lea.vmem %s71_s29, 1024  ;;  %p3037_p6 = scmp.lt.s32.totalorder %s71_s29, %s71_s29 }
  0x15   :  { %p3033_p5 = scmp.ne.s32.totalorder %s71_s29, %s3032_s14  ;;  %p3038_p7 = scmp.lt.s32.totalorder %s3032_s14, %s3032_s14 }
  0x17   :  { %p3039_p8 = por %p3038_p7, %p3037_p6 }
  0x19   :  { %p3040_p9 = pnand %p3039_p8, %p3033_p5 }
  0x1b   :  { %3043 = shalt.err (!%p3040_p9)
}
  0x1c   :  { %76 = dma.hbm_to_vmem [thread:$0]  %s4356_s5, 1024, %s71_s29, [#allocation9], %s3219_s24, %s3219_s24, %s3220_s25  }
  0x1d   :  { %s3052_s3 = scalar_lea.vmem %s96_s13, 128  ;;  %p3057_p11 = scmp.lt.s32.totalorder %s96_s13, %s96_s13 }
  0x1e   :  { %p3053_p10 = scmp.ne.s32.totalorder %s96_s13, %s3052_s3  ;;  %p3058_p12 = scmp.lt.s32.totalorder %s3052_s3, %s3052_s3 }
  0x20   :  { %p3059_p13 = por %p3058_p12, %p3057_p11 }
  0x22   :  { %p3060_p0 = pnand %p3059_p13, %p3053_p10 }
  0x24   :  { %3063 = shalt.err (!%p3060_p0)
}
  0x25   :  { %98 = dma.hbm_to_vmem [thread:$0]  %s4359_s8, 128, %s96_s13, [#allocation12]  }
  0x26   :  { %s3223_s19 = smov [#allocation2]  }
  0x27   :  { %s30_s20 = sshll.u32 %s3223_s19, 4  ;;  %s31_s20 = int_to_ptr.vmem [resolvable:$true] %s30_s20 }
  0x28   :  { %s3072_s21 = scalar_lea.vmem %s31_s20, 512  ;;  %p3077_p2 = scmp.lt.s32.totalorder %s31_s20, %s31_s20 }
  0x29   :  { %p3073_p1 = scmp.ne.s32.totalorder %s31_s20, %s3072_s21  ;;  %p3078_p3 = scmp.lt.s32.totalorder %s3072_s21, %s3072_s21 }
  0x2b   :  { %p3079_p4 = por %p3078_p3, %p3077_p2 }
  0x2d   :  { %p3080_p5 = pnand %p3079_p4, %p3073_p1 }
  0x2f   :  { %3083 = shalt.err (!%p3080_p5)
}
  0x30   :  { %s3224_s5 = smov 128   ;;  %s3225_s22 = smov 8  }
  0x31   :  { %36 = dma.hbm_to_vmem [thread:$0]  %s4351_s0, 512, %s31_s20, [#allocation3], %s3224_s5, %s3224_s5, %s3225_s22  }
  0x32   :  { %s3226_s8 = smov [#allocation7]   ;;  %s3227_s28 = smov [#allocation10]  }
  0x33   :  { %s58_s27 = sshll.u32 %s3226_s8, 4  ;;  %s85_s29 = sshll.u32 %s3227_s28, 4  ;;  %s59_s27 = int_to_ptr.vmem [resolvable:$true] %s58_s27  ;;  %s86_s29 = int_to_ptr.vmem [resolvable:$true] %s85_s29 }
  0x34   :  { %s3092_s30 = scalar_lea.vmem %s59_s27, 1024  ;;  %p3097_p7 = scmp.lt.s32.totalorder %s59_s27, %s59_s27 }
  0x35   :  { %p3093_p6 = scmp.ne.s32.totalorder %s59_s27, %s3092_s30  ;;  %p3098_p8 = scmp.lt.s32.totalorder %s3092_s30, %s3092_s30 }
  0x37   :  { %p3099_p9 = por %p3098_p8, %p3097_p7 }
  0x39   :  { %p3100_p10 = pnand %p3099_p9, %p3093_p6 }
  0x3b   :  { %3103 = shalt.err (!%p3100_p10)
}
  0x3c   :  { %64 = dma.hbm_to_vmem [thread:$0]  %s4355_s4, 1024, %s59_s27, [#allocation6], %s3219_s24, %s3219_s24, %s3220_s25  }
  0x3d   :  { %s3112_s0 = scalar_lea.vmem %s86_s29, 128  ;;  %p3117_p12 = scmp.lt.s32.totalorder %s86_s29, %s86_s29 }
  0x3e   :  { %p3113_p11 = scmp.ne.s32.totalorder %s86_s29, %s3112_s0  ;;  %p3118_p13 = scmp.lt.s32.totalorder %s3112_s0, %s3112_s0 }
  0x40   :  { %p3119_p0 = por %p3118_p13, %p3117_p12 }
  0x42   :  { %p3120_p1 = pnand %p3119_p0, %p3113_p11 }
  0x44   :  { %3123 = shalt.err (!%p3120_p1)
}
  0x45   :  { %88 = dma.hbm_to_vmem [thread:$0]  %s4358_s7, 128, %s86_s29, [#allocation9]  }
  0x46   :  { %s3228_s3 = smov [#allocation13]   ;;  %s3229_s18 = smov [#allocation14]  }
  0x47   :  { %s104_s17 = sshll.u32 %s3228_s3, 4  ;;  %s116_s19 = sshll.u32 %s3229_s18, 4  ;;  %s105_s17 = int_to_ptr.vmem [resolvable:$true] %s104_s17  ;;  %s117_s19 = int_to_ptr.vmem [resolvable:$true] %s116_s19 }
  0x48   :  { %s3132_s20 = scalar_lea.vmem %s105_s17, 1024  ;;  %p3137_p3 = scmp.lt.s32.totalorder %s105_s17, %s105_s17 }
  0x49   :  { %p3133_p2 = scmp.ne.s32.totalorder %s105_s17, %s3132_s20  ;;  %p3138_p4 = scmp.lt.s32.totalorder %s3132_s20, %s3132_s20 }
  0x4b   :  { %p3139_p5 = por %p3138_p4, %p3137_p3 }
  0x4d   :  { %p3140_p6 = pnand %p3139_p5, %p3133_p2 }
  0x4f   :  { %3143 = shalt.err (!%p3140_p6)
}
  0x50   :  { %110 = dma.hbm_to_vmem [thread:$0]  %s4360_s9, 1024, %s105_s17, [#allocation12], %s3219_s24, %s3219_s24, %s3220_s25  }
  0x51   :  { %s3152_s7 = scalar_lea.vmem %s117_s19, 1024  ;;  %p3157_p8 = scmp.lt.s32.totalorder %s117_s19, %s117_s19 }
  0x52   :  { %p3153_p7 = scmp.ne.s32.totalorder %s117_s19, %s3152_s7  ;;  %p3158_p9 = scmp.lt.s32.totalorder %s3152_s7, %s3152_s7 }
  0x54   :  { %p3159_p10 = por %p3158_p9, %p3157_p8 }
  0x56   :  { %p3160_p11 = pnand %p3159_p10, %p3153_p7 }
  0x58   :  { %3163 = shalt.err (!%p3160_p11)
}
  0x59   :  { %122 = dma.hbm_to_vmem [thread:$0]  %s4361_s10, 1024, %s117_s19, [#allocation15], %s3219_s24, %s3219_s24, %s3220_s25  }
  0x5a   :  { %3204 = dma.done.wait [#allocation3], 512  }
  0x5b   :  { %3205 = vsyncadd [#allocation3], 4294966784 }
  0x5c   :  { %3206 = dma.done.wait [#allocation6], 2048  }
  0x5d   :  { %3207 = vsyncadd [#allocation6], 4294965248 }
  0x5e   :  { %3208 = dma.done.wait [#allocation9], 1152  }
  0x5f   :  { %3209 = vsyncadd [#allocation9], 4294966144 }
  0x60   :  { %3210 = dma.done.wait [#allocation12], 1152  }
  0x61   :  { %3211 = vsyncadd [#allocation12], 4294966144 }
  0x62   :  { %3212 = dma.done.wait [#allocation15], 1024  }
  0x63   :  { %3213 = vsyncadd [#allocation15], 4294966272  ;;  %v3230_v0 = vmov 0   ;;  %v162_v1 = vld [vmem:[%s4353_s2 + $0x10] sm:$0xff]  ;;  %v160_v2 = vld [vmem:[%s4353_s2] sm:$0xff] }
  0x64   :  { %2835 = vset.pattern.permute.xlu1 %v3230_v0  ;;  %2834 = vset.pattern.permute.xlu0 %v3230_v0  ;;  %v163_v3 = vld [vmem:[%s4353_s2 + $0x18] sm:$0xff]  ;;  %v161_v4 = vld [vmem:[%s4353_s2 + $0x8] sm:$0xff]  ;;  %v164_v6 = vld [vmem:[%s4353_s2 + $0x20] sm:$0xff] }
  0x65   :  { %204 = vperm.xlu1 %2835, %v162_v1   ;;  %194 = vperm.xlu0 %2834, %v160_v2   ;;  %v165_v5 = vld [vmem:[%s4353_s2 + $0x28] sm:$0xff]  ;;  %v2836_v7 = vld [vmem:[#allocation5 + $0x38] sm:$0xff]   ;;  %v2837_v8 = vld [vmem:[#allocation5 + $0x30] sm:$0xff]  }
  0x66   :  { %2563 = vmatprep.subr.bf16.mxu0 %v2836_v7  ;;  %v167_v9 = vld [vmem:[%s4353_s2 + $0x38] sm:$0xff]  ;;  %v166_v10 = vld [vmem:[%s4353_s2 + $0x30] sm:$0xff]  ;;  %v2838_v11 = vld [vmem:[#allocation5 + $0x28] sm:$0xff]  }
  0x67   :  { %2564 = vmatpush3.bf16.msra.mxu0 %v2836_v7  ;;  %v169_v12 = vld [vmem:[%s4353_s2 + $0x48] sm:$0xff]  ;;  %v168_v13 = vld [vmem:[%s4353_s2 + $0x40] sm:$0xff]  ;;  %v171_v15 = vld [vmem:[%s4353_s2 + $0x58] sm:$0xff] }
  0x68   :  { %2565 = vmatprep.subr.bf16.mxu0 %v2837_v8  ;;  %v2839_v14 = vld [vmem:[#allocation5 + $0x20] sm:$0xff]   ;;  %v170_v16 = vld [vmem:[%s4353_s2 + $0x50] sm:$0xff]  ;;  %v2840_v17 = vld [vmem:[#allocation5 + $0x18] sm:$0xff]  }
  0x69   :  { %209 = vperm.xlu1 %2835, %v163_v3   ;;  %199 = vperm.xlu0 %2834, %v161_v4   ;;  %v173_v18 = vld [vmem:[%s4353_s2 + $0x68] sm:$0xff]  ;;  %v172_v19 = vld [vmem:[%s4353_s2 + $0x60] sm:$0xff]  ;;  %v2841_v20 = vld [vmem:[#allocation5 + $0x10] sm:$0xff]  }
  0x6a   :  { %v175_v21 = vld [vmem:[%s4353_s2 + $0x78] sm:$0xff]  ;;  %v174_v22 = vld [vmem:[%s4353_s2 + $0x70] sm:$0xff]  ;;  %v2842_v23 = vld [vmem:[#allocation5 + $0x8] sm:$0xff]  }
  0x6b   :  { %2566 = vmatpush3.bf16.msra.mxu0 %v2837_v8  ;;  %v2843_v24 = vld [vmem:[#allocation5] sm:$0xff]   ;;  %v177_v28 = vld [vmem:[%s4352_s1 + $0x8] sm:$0xff]  ;;  %v178_v29 = vld [vmem:[%s4352_s1 + $0x10] sm:$0xff] }
  0x6c   :  { %2567 = vmatprep.subr.bf16.mxu0 %v2838_v11  ;;  %v176_v27 = vld [vmem:[%s4352_s1] sm:$0xff]  ;;  %v179_v30 = vld [vmem:[%s4352_s1 + $0x18] sm:$0xff]  ;;  %v181_v38 = vld [vmem:[%s4352_s1 + $0x28] sm:$0xff] }
  0x6d   :  { %219 = vperm.xlu1 %2835, %v165_v5   ;;  %214 = vperm.xlu0 %2834, %v164_v6   ;;  %v180_v37 = vld [vmem:[%s4352_s1 + $0x20] sm:$0xff]  ;;  %v182_v45 = vld [vmem:[%s4352_s1 + $0x30] sm:$0xff]  ;;  %v183_v46 = vld [vmem:[%s4352_s1 + $0x38] sm:$0xff] }
  0x6e   :  { %v184_v52 = vld [vmem:[%s4352_s1 + $0x40] sm:$0xff]  ;;  %v185_v53 = vld [vmem:[%s4352_s1 + $0x48] sm:$0xff]  ;;  %v186_v59 = vld [vmem:[%s4352_s1 + $0x50] sm:$0xff] }
  0x6f   :  { %2568 = vmatpush3.bf16.msra.mxu0 %v2838_v11  ;;  %v187_v60 = vld [vmem:[%s4352_s1 + $0x58] sm:$0xff]  ;;  %v188_v2 = vld [vmem:[%s4352_s1 + $0x60] sm:$0xff]  ;;  %v189_v3 = vld [vmem:[%s4352_s1 + $0x68] sm:$0xff] }
  0x70   :  { %2569 = vmatprep.subr.bf16.mxu0 %v2839_v14 }
  0x71   :  { %229 = vperm.xlu1 %2835, %v167_v9   ;;  %224 = vperm.xlu0 %2834, %v166_v10   ;;  %v190_v9 = vld [vmem:[%s4352_s1 + $0x70] sm:$0xff]  ;;  %v191_v10 = vld [vmem:[%s4352_s1 + $0x78] sm:$0xff] }
  0x73   :  { %2570 = vmatpush3.bf16.msra.mxu0 %v2839_v14 }
  0x74   :  { %2571 = vmatprep.subr.bf16.mxu0 %v2840_v17 }
  0x75   :  { %239 = vperm.xlu1 %2835, %v169_v12   ;;  %234 = vperm.xlu0 %2834, %v168_v13  }
  0x77   :  { %2572 = vmatpush3.bf16.msra.mxu0 %v2840_v17  ;;  %v148_v17 = vld [vmem:[#allocation2] sm:$0xff] }
  0x78   :  { %2573 = vmatprep.subr.bf16.mxu0 %v2841_v20 }
  0x79   :  { %249 = vperm.xlu1 %2835, %v171_v15   ;;  %244 = vperm.xlu0 %2834, %v170_v16  }
  0x7b   :  { %2574 = vmatpush3.bf16.msra.mxu0 %v2841_v20 }
  0x7c   :  { %2575 = vmatprep.subr.bf16.mxu0 %v2842_v23 }
  0x7d   :  { %259 = vperm.xlu1 %2835, %v173_v18   ;;  %254 = vperm.xlu0 %2834, %v172_v19   ;;  %v3484_v18 = vunpack.c.l.s8.bf16 %v148_v17 }
  0x7f   :  { %2576 = vmatpush3.bf16.msra.mxu0 %v2842_v23  ;;  %2611 = vmatprep.mubr.bf16.mxu1 %v3484_v18 }
  0x80   :  { %2577 = vmatprep.subr.bf16.mxu0 %v2843_v24 }
  0x81   :  { %269 = vperm.xlu1 %2835, %v175_v21   ;;  %264 = vperm.xlu0 %2834, %v174_v22  }
  0x83   :  { %2578 = vmatpush3.bf16.msra.mxu0 %v2843_v24 }
  0xe0   :  { %v3388_v25 = vpop.permute.xlu1 %204  ;;  %v3390_v26 = vpop.permute.xlu0 %194 }
  0xe1   :  { %v272_v33 = vmul.f32 %v3390_v26, %v176_v27  ;;  %v274_v35 = vmul.f32 %v3388_v25, %v178_v29 }
  0xe4   :  { %v3404_v31 = vpop.permute.xlu1 %209  ;;  %v3406_v32 = vpop.permute.xlu0 %199 }
  0xe5   :  { %v273_v34 = vmul.f32 %v3406_v32, %v177_v28  ;;  %v275_v36 = vmul.f32 %v3404_v31, %v179_v30 }
  0xe7   :  { %v288_v39 = vpack.c.bf16 %v273_v34, %v272_v33  ;;  %v289_v40 = vpack.c.bf16 %v275_v36, %v274_v35 }
  0xe8   :  { %v3418_v41 = vpop.permute.xlu1 %219  ;;  %v3420_v42 = vpop.permute.xlu0 %214 }
  0xe9   :  { %2579 = vmatprep.mubr.bf16.mxu0 %v288_v39  ;;  %v276_v43 = vmul.f32 %v3420_v42, %v180_v37  ;;  %v277_v44 = vmul.f32 %v3418_v41, %v181_v38 }
  0xea   :  { %2580 = vmatmul.mubr.bf16.vlgmr.msra.gmra.mxu0 %v289_v40 }
  0xeb   :  { %v290_v47 = vpack.c.bf16 %v277_v44, %v276_v43 }
  0xec   :  { %v3430_v48 = vpop.permute.xlu1 %229  ;;  %v3432_v49 = vpop.permute.xlu0 %224 }
  0xed   :  { %2583 = vmatprep.mubr.bf16.mxu0 %v290_v47  ;;  %v278_v50 = vmul.f32 %v3432_v49, %v182_v45  ;;  %v279_v51 = vmul.f32 %v3430_v48, %v183_v46 }
  0xef   :  { %v291_v54 = vpack.c.bf16 %v279_v51, %v278_v50  ;;  %v149_v51 = vld [vmem:[#allocation2 + $0x8] sm:$0xff] }
  0xf0   :  { %v3442_v55 = vpop.permute.xlu1 %239  ;;  %v3444_v56 = vpop.permute.xlu0 %234 }
  0xf1   :  { %v280_v57 = vmul.f32 %v3444_v56, %v184_v52  ;;  %v281_v58 = vmul.f32 %v3442_v55, %v185_v53  ;;  %v3487_v52 = vunpack.c.h.s8.bf16 %v148_v17  ;;  %v3489_v53 = vunpack.c.l.s8.bf16 %v149_v51 }
  0xf2   :  { %2584 = vmatmul.mubr.bf16.gmra.mxu0 %v291_v54  ;;  %v150_v54 = vld [vmem:[#allocation2 + $0x10] sm:$0xff] }
  0xf3   :  { %v292_v61 = vpack.c.bf16 %v281_v58, %v280_v57  ;;  %v3493_v57 = vunpack.c.h.s8.bf16 %v149_v51  ;;  %v3495_v58 = vunpack.c.l.s8.bf16 %v150_v54 }
  0xf4   :  { %v3454_v62 = vpop.permute.xlu1 %249  ;;  %v3456_v63 = vpop.permute.xlu0 %244 }
  0xf5   :  { %2587 = vmatprep.mubr.bf16.mxu0 %v292_v61  ;;  %v282_v0 = vmul.f32 %v3456_v63, %v186_v59  ;;  %v283_v1 = vmul.f32 %v3454_v62, %v187_v60  ;;  %v151_v59 = vld [vmem:[#allocation2 + $0x18] sm:$0xff]  ;;  %v3499_v60 = vunpack.c.h.s8.bf16 %v150_v54 }
  0xf6   :  { %v3501_v61 = vunpack.c.l.s8.bf16 %v151_v59 }
  0xf7   :  { %v293_v4 = vpack.c.bf16 %v283_v1, %v282_v0  ;;  %v3505_v0 = vunpack.c.h.s8.bf16 %v151_v59 }
  0xf8   :  { %v3466_v5 = vpop.permute.xlu1 %259  ;;  %v3468_v6 = vpop.permute.xlu0 %254 }
  0xf9   :  { %v284_v7 = vmul.f32 %v3468_v6, %v188_v2  ;;  %v285_v8 = vmul.f32 %v3466_v5, %v189_v3 }
  0xfa   :  { %2588 = vmatmul.mubr.bf16.gmra.mxu0 %v293_v4 }
  0xfb   :  { %v294_v11 = vpack.c.bf16 %v285_v8, %v284_v7  ;;  %v3514_v8 = vld [vmem:[%s4357_s6] ss:$0 sm:$0xff] }
  0xfc   :  { %v3478_v12 = vpop.permute.xlu1 %269  ;;  %v3480_v13 = vpop.permute.xlu0 %264 }
  0xfd   :  { %2591 = vmatprep.mubr.bf16.mxu0 %v294_v11  ;;  %v286_v14 = vmul.f32 %v3480_v13, %v190_v9  ;;  %v287_v15 = vmul.f32 %v3478_v12, %v191_v10 }
  0xff   :  { %v295_v16 = vpack.c.bf16 %v287_v15, %v286_v14 }
 0x102   :  { %2592 = vmatmul.mubr.bf16.gmra.mxu0 %v295_v16 }
 0x1aa   :  { %v2581_v19 = vpop.f32.mrf.mxu0 }
 0x1ac   :  { %v394_v20 = vpop.f32.mrf.mxu0 }
 0x1ae   :  { %v2582_v21 = vpop.f32.mrf.mxu0 }
 0x1af   :  { %v458_v47 = vpack.c.bf16 %v2582_v21, %v2581_v19 }
 0x1b0   :  { %v397_v22 = vpop.f32.mrf.mxu0 }
 0x1b1   :  { %v457_v50 = vpack.c.bf16 %v397_v22, %v394_v20 }
 0x1b2   :  { %v2585_v23 = vpop.f32.mrf.mxu0 }
 0x1b4   :  { %v410_v24 = vpop.f32.mrf.mxu0 }
 0x1b6   :  { %v2586_v27 = vpop.f32.mrf.mxu0 }
 0x1b7   :  { %v460_v45 = vpack.c.bf16 %v2586_v27, %v2585_v23 }
 0x1b8   :  { %v413_v28 = vpop.f32.mrf.mxu0 }
 0x1b9   :  { %v459_v46 = vpack.c.bf16 %v413_v28, %v410_v24 }
 0x1ba   :  { %v2589_v29 = vpop.f32.mrf.mxu0 }
 0x1bc   :  { %v426_v30 = vpop.f32.mrf.mxu0 }
 0x1be   :  { %v2590_v33 = vpop.f32.mrf.mxu0 }
 0x1bf   :  { %v462_v43 = vpack.c.bf16 %v2590_v33, %v2589_v29 }
 0x1c0   :  { %v429_v34 = vpop.f32.mrf.mxu0 }
 0x1c1   :  { %v461_v44 = vpack.c.bf16 %v429_v34, %v426_v30 }
 0x1c2   :  { %v2593_v35 = vpop.f32.mrf.mxu0 }
 0x1c4   :  { %v442_v36 = vpop.f32.mrf.mxu0 }
 0x1c6   :  { %v2594_v37 = vpop.f32.mrf.mxu0 }
 0x1c7   :  { %v464_v38 = vpack.c.bf16 %v2594_v37, %v2593_v35 }
 0x1c8   :  { %v445_v39 = vpop.f32.mrf.mxu0 }
 0x1c9   :  { %v463_v40 = vpack.c.bf16 %v445_v39, %v442_v36  ;;  %2595 = vmatprep.subr.bf16.mxu1 %v464_v38 }
 0x1ca   :  { %2596 = vmatpush3.bf16.msra.mxu1 %v464_v38 }
 0x1cb   :  { %2597 = vmatprep.subr.bf16.mxu1 %v463_v40 }
 0x1ce   :  { %2598 = vmatpush3.bf16.msra.mxu1 %v463_v40 }
 0x1cf   :  { %2599 = vmatprep.subr.bf16.mxu1 %v462_v43 }
 0x1d2   :  { %2600 = vmatpush3.bf16.msra.mxu1 %v462_v43 }
 0x1d3   :  { %2601 = vmatprep.subr.bf16.mxu1 %v461_v44 }
 0x1d6   :  { %2602 = vmatpush3.bf16.msra.mxu1 %v461_v44 }
 0x1d7   :  { %2603 = vmatprep.subr.bf16.mxu1 %v460_v45 }
 0x1da   :  { %2604 = vmatpush3.bf16.msra.mxu1 %v460_v45 }
 0x1db   :  { %2605 = vmatprep.subr.bf16.mxu1 %v459_v46 }
 0x1de   :  { %2606 = vmatpush3.bf16.msra.mxu1 %v459_v46 }
 0x1df   :  { %2607 = vmatprep.subr.bf16.mxu1 %v458_v47 }
 0x1e2   :  { %2608 = vmatpush3.bf16.msra.mxu1 %v458_v47 }
 0x1e3   :  { %2609 = vmatprep.subr.bf16.mxu1 %v457_v50 }
 0x1e6   :  { %2610 = vmatpush3.bf16.msra.mxu1 %v457_v50 }
 0x1e9   :  { %2612 = vmatmul.mubr.bf16.vlgmr.msra.gmra.mxu1 %v3487_v52 }
 0x1ea   :  { %2615 = vmatprep.mubr.bf16.mxu1 %v3489_v53 }
 0x1f1   :  { %2616 = vmatmul.mubr.bf16.gmra.mxu1 %v3493_v57 }
 0x1f2   :  { %2619 = vmatprep.mubr.bf16.mxu1 %v3495_v58 }
 0x1f9   :  { %2620 = vmatmul.mubr.bf16.gmra.mxu1 %v3499_v60 }
 0x1fa   :  { %2623 = vmatprep.mubr.bf16.mxu1 %v3501_v61 }
 0x201   :  { %2624 = vmatmul.mubr.bf16.gmra.mxu1 %v3505_v0 }
 0x202   :  { %2675 = vmatprep.mubr.bf16.mxu1 %v3484_v18 }
 0x2a9   :  { %v2613_v1 = vpop.f32.mrf.mxu1 }
 0x2aa   :  { %v564_v3 = vmul.f32 %v2613_v1, %v3388_v25 }
 0x2ab   :  { %v499_v2 = vpop.f32.mrf.mxu1 }
 0x2ac   :  { %v562_v4 = vmul.f32 %v499_v2, %v3390_v26  ;;  %v3523_v16 = vadd.f32 %v3514_v8, %v564_v3 }
 0x2ad   :  { %v2614_v7 = vpop.f32.mrf.mxu1 }
 0x2ae   :  { %v3517_v9 = vadd.f32 %v3514_v8, %v562_v4  ;;  %v565_v11 = vmul.f32 %v2614_v7, %v3404_v31  ;;  %v603_v23 = vmax.f32 %v3523_v16, 0.0 }
 0x2af   :  { %v502_v10 = vpop.f32.mrf.mxu1 }
 0x2b0   :  { %v563_v14 = vmul.f32 %v502_v10, %v3406_v32  ;;  %v601_v15 = vmax.f32 %v3517_v9, 0.0  ;;  %v3535_v27 = vadd.f32 %v3514_v8, %v565_v11 }
 0x2b1   :  { %v2617_v17 = vpop.f32.mrf.mxu1 }
 0x2b2   :  { %620 = vadd.xlane.f32.xlu0 %v601_v15  ;;  %v3528_v19 = vadd.f32 %v3514_v8, %v563_v14  ;;  %v568_v20 = vmul.f32 %v2617_v17, %v3432_v49  ;;  %v604_v36 = vmax.f32 %v3535_v27, 0.0 }
 0x2b3   :  { %v515_v21 = vpop.f32.mrf.mxu1 }
 0x2b4   :  { %v566_v22 = vmul.f32 %v515_v21, %v3420_v42  ;;  %v602_v24 = vmax.f32 %v3528_v19, 0.0  ;;  %v3545_v33 = vadd.f32 %v3514_v8, %v568_v20 }
 0x2b5   :  { %v2618_v28 = vpop.f32.mrf.mxu1 }
 0x2b6   :  { %624 = vadd.xlane.f32.xlu0 %v603_v23  ;;  %622 = vadd.xlane.f32.xlu1 %v602_v24  ;;  %v3542_v29 = vadd.f32 %v3514_v8, %v566_v22  ;;  %v569_v34 = vmul.f32 %v2618_v28, %v3430_v48  ;;  %v607_v43 = vmax.f32 %v3545_v33, 0.0 }
 0x2b7   :  { %v518_v30 = vpop.f32.mrf.mxu1 }
 0x2b8   :  { %v567_v35 = vmul.f32 %v518_v30, %v3418_v41  ;;  %v605_v37 = vmax.f32 %v3542_v29, 0.0  ;;  %v3563_v47 = vadd.f32 %v3514_v8, %v569_v34 }
 0x2b9   :  { %v2621_v38 = vpop.f32.mrf.mxu1 }
 0x2ba   :  { %626 = vadd.xlane.f32.xlu0 %v604_v36  ;;  %628 = vadd.xlane.f32.xlu1 %v605_v37  ;;  %v3556_v39 = vadd.f32 %v3514_v8, %v567_v35  ;;  %v572_v44 = vmul.f32 %v2621_v38, %v3456_v63  ;;  %v608_v2 = vmax.f32 %v3563_v47, 0.0 }
 0x2bb   :  { %v531_v40 = vpop.f32.mrf.mxu1 }
 0x2bc   :  { %v570_v45 = vmul.f32 %v531_v40, %v3444_v56  ;;  %v606_v46 = vmax.f32 %v3556_v39, 0.0  ;;  %v3577_v4 = vadd.f32 %v3514_v8, %v572_v44 }
 0x2bd   :  { %v2622_v50 = vpop.f32.mrf.mxu1 }
 0x2be   :  { %632 = vadd.xlane.f32.xlu1 %v607_v43  ;;  %630 = vadd.xlane.f32.xlu0 %v606_v46  ;;  %v3570_v51 = vadd.f32 %v3514_v8, %v570_v45  ;;  %v573_v54 = vmul.f32 %v2622_v50, %v3454_v62  ;;  %v611_v21 = vmax.f32 %v3577_v4, 0.0  ;;  %v2845_v4 = vld [vmem:[#allocation7 + $0x30] sm:$0xff]  }
 0x2bf   :  { %v534_v59 = vpop.f32.mrf.mxu1 }
 0x2c0   :  { %v571_v1 = vmul.f32 %v534_v59, %v3442_v55  ;;  %v609_v3 = vmax.f32 %v3570_v51, 0.0  ;;  %v3587_v14 = vadd.f32 %v3514_v8, %v573_v54 }
 0x2c1   :  { %v2625_v7 = vpop.f32.mrf.mxu1 }
 0x2c2   :  { %634 = vadd.xlane.f32.xlu0 %v608_v2  ;;  %636 = vadd.xlane.f32.xlu1 %v609_v3  ;;  %v3584_v10 = vadd.f32 %v3514_v8, %v571_v1  ;;  %v576_v17 = vmul.f32 %v2625_v7, %v3480_v13  ;;  %v612_v35 = vmax.f32 %v3587_v14, 0.0  ;;  %v2846_v14 = vld [vmem:[#allocation7 + $0x28] sm:$0xff]  }
 0x2c3   :  { %v547_v11 = vpop.f32.mrf.mxu1 }
 0x2c4   :  { %v574_v20 = vmul.f32 %v547_v11, %v3468_v6  ;;  %v610_v22 = vmax.f32 %v3584_v10, 0.0  ;;  %v3605_v45 = vadd.f32 %v3514_v8, %v576_v17  ;;  %v617_v11 = vlaneseq }
 0x2c5   :  { %v2626_v28 = vpop.f32.mrf.mxu1 }
 0x2c6   :  { %640 = vadd.xlane.f32.xlu1 %v611_v21  ;;  %638 = vadd.xlane.f32.xlu0 %v610_v22  ;;  %v3598_v30 = vadd.f32 %v3514_v8, %v574_v20  ;;  %v577_v38 = vmul.f32 %v2626_v28, %v3478_v12  ;;  %v4364_v54 = vmax.f32 %v3605_v45, 0.0  ;;  %v3626_v17 = vand.u32 127, %v617_v11 }
 0x2c7   :  { %v550_v34 = vpop.f32.mrf.mxu1 }
 0x2c8   :  { %v575_v40 = vmul.f32 %v550_v34, %v3466_v5  ;;  %v4367_v44 = vmax.f32 %v3598_v30, 0.0  ;;  %v3617_v1 = vadd.f32 %v3514_v8, %v577_v38  ;;  %vm619_vm0 = vcmp.lt.s32.totalorder %v3626_v17, 32 }
 0x2c9   :  { %vm2138_vm1 = vcmp.lt.s32.totalorder %v3626_v17, 8 }
 0x2ca   :  { %642 = vadd.xlane.f32.xlu0 %v612_v35  ;;  %644 = vadd.xlane.f32.xlu1 %v4367_v44  ;;  %v3612_v50 = vadd.f32 %v3514_v8, %v575_v40  ;;  %v4366_v7 = vmax.f32 %v3617_v1, 0.0 }
 0x2cc   :  { %v4365_v59 = vmax.f32 %v3612_v50, 0.0 }
 0x2ce   :  { %648 = vadd.xlane.f32.xlu1 %v4364_v54  ;;  %646 = vadd.xlane.f32.xlu0 %v4365_v59 }
 0x2d2   :  { %650 = vadd.xlane.f32.xlu0 %v4366_v7 }
 0x33b   :  { %v621_v20 = vpop.xlane.xlu0 %620 }
 0x33c   :  { %v652_v28 = vmul.f32 0.03125, %v621_v20 }
 0x33e   :  { %v668_v8 = vsub.f32 %v601_v15, %v652_v28 }
 0x33f   :  { %v625_v34 = vpop.xlane.xlu0 %624  ;;  %v623_v38 = vpop.xlane.xlu1 %622 }
 0x340   :  { %v654_v40 = vmul.f32 0.03125, %v625_v34  ;;  %v653_v54 = vmul.f32 0.03125, %v623_v38  ;;  %v3633_v59 = vsel %vm619_vm0, %v668_v8, 0.0 }
 0x341   :  { %v702_v7 = vmul.f32 %v3633_v59, %v3633_v59 }
 0x342   :  { %v670_v11 = vsub.f32 %v603_v23, %v654_v40  ;;  %v669_v20 = vsub.f32 %v602_v24, %v653_v54 }
 0x343   :  { %v627_v44 = vpop.xlane.xlu0 %626  ;;  %v629_v9 = vpop.xlane.xlu1 %628  ;;  %718 = vadd.xlane.f32.xlu1 %v702_v7 }
 0x344   :  { %v655_v15 = vmul.f32 0.03125, %v627_v44  ;;  %v656_v28 = vmul.f32 0.03125, %v629_v9  ;;  %v3643_v34 = vsel %vm619_vm0, %v670_v11, 0.0  ;;  %v3647_v8 = vsel %vm619_vm0, %v669_v20, 0.0 }
 0x345   :  { %v704_v16 = vmul.f32 %v3643_v34, %v3643_v34  ;;  %v703_v19 = vmul.f32 %v3647_v8, %v3647_v8 }
 0x346   :  { %v671_v23 = vsub.f32 %v604_v36, %v655_v15  ;;  %v672_v24 = vsub.f32 %v605_v37, %v656_v28 }
 0x347   :  { %v633_v44 = vpop.xlane.xlu1 %632  ;;  %v631_v54 = vpop.xlane.xlu0 %630  ;;  %722 = vadd.xlane.f32.xlu1 %v704_v16  ;;  %720 = vadd.xlane.f32.xlu0 %v703_v19 }
 0x348   :  { %v658_v7 = vmul.f32 0.03125, %v633_v44  ;;  %v657_v38 = vmul.f32 0.03125, %v631_v54  ;;  %v3659_v40 = vsel %vm619_vm0, %v672_v24, 0.0  ;;  %v3663_v11 = vsel %vm619_vm0, %v671_v23, 0.0 }
 0x349   :  { %v706_v27 = vmul.f32 %v3659_v40, %v3659_v40  ;;  %v705_v29 = vmul.f32 %v3663_v11, %v3663_v11 }
 0x34a   :  { %v674_v36 = vsub.f32 %v607_v43, %v658_v7  ;;  %v673_v37 = vsub.f32 %v606_v46, %v657_v38 }
 0x34b   :  { %v635_v20 = vpop.xlane.xlu0 %634  ;;  %v637_v9 = vpop.xlane.xlu1 %636  ;;  %726 = vadd.xlane.f32.xlu1 %v706_v27  ;;  %724 = vadd.xlane.f32.xlu0 %v705_v29  ;;  %v2844_v27 = vld [vmem:[#allocation7 + $0x38] sm:$0xff]  }
 0x34c   :  { %v659_v15 = vmul.f32 0.03125, %v635_v20  ;;  %v660_v28 = vmul.f32 0.03125, %v637_v9  ;;  %v3675_v16 = vsel %vm619_vm0, %v674_v36, 0.0  ;;  %v3679_v19 = vsel %vm619_vm0, %v673_v37, 0.0  ;;  %2627 = vmatprep.subr.bf16.mxu0 %v2844_v27 }
 0x34d   :  { %v708_v33 = vmul.f32 %v3675_v16, %v3675_v16  ;;  %v707_v39 = vmul.f32 %v3679_v19, %v3679_v19  ;;  %2628 = vmatpush3.bf16.msra.mxu0 %v2844_v27 }
 0x34e   :  { %v675_v43 = vsub.f32 %v608_v2, %v659_v15  ;;  %v676_v46 = vsub.f32 %v609_v3, %v660_v28  ;;  %v4371_v28 = vmax.f32 %v3598_v30, 0.0  ;;  %2629 = vmatprep.subr.bf16.mxu0 %v2845_v4 }
 0x34f   :  { %v641_v23 = vpop.xlane.xlu1 %640  ;;  %v639_v24 = vpop.xlane.xlu0 %638  ;;  %730 = vadd.xlane.f32.xlu1 %v708_v33  ;;  %728 = vadd.xlane.f32.xlu0 %v707_v39 }
 0x350   :  { %v662_v44 = vmul.f32 0.03125, %v641_v23  ;;  %v661_v54 = vmul.f32 0.03125, %v639_v24  ;;  %v3691_v7 = vsel %vm619_vm0, %v676_v46, 0.0  ;;  %v3695_v38 = vsel %vm619_vm0, %v675_v43, 0.0 }
 0x351   :  { %v710_v47 = vmul.f32 %v3691_v7, %v3691_v7  ;;  %v709_v51 = vmul.f32 %v3695_v38, %v3695_v38  ;;  %2630 = vmatpush3.bf16.msra.mxu0 %v2845_v4 }
 0x352   :  { %v678_v2 = vsub.f32 %v611_v21, %v662_v44  ;;  %v677_v3 = vsub.f32 %v610_v22, %v661_v54  ;;  %v4372_v54 = vmax.f32 %v3605_v45, 0.0  ;;  %2631 = vmatprep.subr.bf16.mxu0 %v2846_v14 }
 0x353   :  { %v643_v29 = vpop.xlane.xlu0 %642  ;;  %734 = vadd.xlane.f32.xlu1 %v710_v47  ;;  %v645_v36 = vpop.xlane.xlu1 %644  ;;  %732 = vadd.xlane.f32.xlu0 %v709_v51  ;;  %v4373_v47 = vmax.f32 %v3612_v50, 0.0 }
 0x354   :  { %v663_v37 = vmul.f32 0.03125, %v643_v29  ;;  %v664_v20 = vmul.f32 0.03125, %v645_v36  ;;  %v3707_v9 = vsel %vm619_vm0, %v678_v2, 0.0  ;;  %v3711_v15 = vsel %vm619_vm0, %v677_v3, 0.0 }
 0x355   :  { %v712_v10 = vmul.f32 %v3707_v9, %v3707_v9  ;;  %v711_v21 = vmul.f32 %v3711_v15, %v3711_v15  ;;  %2632 = vmatpush3.bf16.msra.mxu0 %v2846_v14 }
 0x356   :  { %v679_v22 = vsub.f32 %v612_v35, %v663_v37  ;;  %v680_v33 = vsub.f32 %v4371_v28, %v664_v20  ;;  %v2847_v37 = vld [vmem:[#allocation7 + $0x20] sm:$0xff]   ;;  %v4374_v20 = vmax.f32 %v3617_v1, 0.0  ;;  %v2849_v28 = vld [vmem:[#allocation7 + $0x10] sm:$0xff]   ;;  %v2850_v1 = vld [vmem:[#allocation7 + $0x8] sm:$0xff]  }
 0x357   :  { %738 = vadd.xlane.f32.xlu1 %v712_v10  ;;  %v649_v39 = vpop.xlane.xlu1 %648  ;;  %736 = vadd.xlane.f32.xlu0 %v711_v21  ;;  %v647_v43 = vpop.xlane.xlu0 %646  ;;  %v2848_v21 = vld [vmem:[#allocation7 + $0x18] sm:$0xff]  }
 0x358   :  { %v666_v46 = vmul.f32 0.03125, %v649_v39  ;;  %v665_v23 = vmul.f32 0.03125, %v647_v43  ;;  %v3723_v24 = vsel %vm619_vm0, %v680_v33, 0.0  ;;  %v3727_v44 = vsel %vm619_vm0, %v679_v22, 0.0  ;;  %2633 = vmatprep.subr.bf16.mxu0 %v2847_v37  ;;  %v2851_v33 = vld [vmem:[#allocation7] sm:$0xff]  }
 0x359   :  { %v714_v30 = vmul.f32 %v3723_v24, %v3723_v24  ;;  %v713_v35 = vmul.f32 %v3727_v44, %v3727_v44  ;;  %2634 = vmatpush3.bf16.msra.mxu0 %v2847_v37 }
 0x35a   :  { %v682_v27 = vsub.f32 %v4372_v54, %v666_v46  ;;  %v681_v51 = vsub.f32 %v4373_v47, %v665_v23  ;;  %2635 = vmatprep.subr.bf16.mxu0 %v2848_v21 }
 0x35b   :  { %742 = vadd.xlane.f32.xlu1 %v714_v30  ;;  %740 = vadd.xlane.f32.xlu0 %v713_v35  ;;  %v651_v2 = vpop.xlane.xlu0 %650 }
 0x35c   :  { %v667_v3 = vmul.f32 0.03125, %v651_v2  ;;  %v3739_v29 = vsel %vm619_vm0, %v682_v27, 0.0  ;;  %v3743_v36 = vsel %vm619_vm0, %v681_v51, 0.0 }
 0x35d   :  { %v716_v45 = vmul.f32 %v3739_v29, %v3739_v29  ;;  %v715_v50 = vmul.f32 %v3743_v36, %v3743_v36  ;;  %2636 = vmatpush3.bf16.msra.mxu0 %v2848_v21 }
 0x35e   :  { %v683_v4 = vsub.f32 %v4374_v20, %v667_v3  ;;  %2637 = vmatprep.subr.bf16.mxu0 %v2849_v28 }
 0x35f   :  { %746 = vadd.xlane.f32.xlu1 %v716_v45  ;;  %744 = vadd.xlane.f32.xlu0 %v715_v50 }
 0x360   :  { %v3753_v10 = vsel %vm619_vm0, %v683_v4, 0.0 }
 0x361   :  { %v717_v22 = vmul.f32 %v3753_v10, %v3753_v10  ;;  %2638 = vmatpush3.bf16.msra.mxu0 %v2849_v28 }
 0x362   :  { %2639 = vmatprep.subr.bf16.mxu0 %v2850_v1 }
 0x363   :  { %748 = vadd.xlane.f32.xlu0 %v717_v22 }
 0x365   :  { %2640 = vmatpush3.bf16.msra.mxu0 %v2850_v1 }
 0x366   :  { %2641 = vmatprep.subr.bf16.mxu0 %v2851_v33 }
 0x369   :  { %2642 = vmatpush3.bf16.msra.mxu0 %v2851_v33 }
 0x3cc   :  { %v719_v39 = vpop.xlane.xlu1 %718 }
 0x3cd   :  { %v750_v43 = vmul.f32 0.03125, %v719_v39 }
 0x3cf   :  { %v766_v46 = vadd.f32 1e-05, %v750_v43 }
 0x3d0   :  { %v723_v23 = vpop.xlane.xlu1 %722  ;;  %v721_v14 = vpop.xlane.xlu0 %720 }
 0x3d1   :  { %2876 = vrsqrt.f32 %v766_v46  ;;  %v752_v30 = vmul.f32 0.03125, %v723_v23  ;;  %v751_v35 = vmul.f32 0.03125, %v721_v14  ;;  %v3760_v23 = vld [vmem:[%s4357_s6 + $0x1] ss:$0 sm:$0xff] }
 0x3d3   :  { %v768_v54 = vadd.f32 1e-05, %v752_v30  ;;  %v767_v27 = vadd.f32 1e-05, %v751_v35 }
 0x3d4   :  { %v727_v47 = vpop.xlane.xlu1 %726  ;;  %v725_v51 = vpop.xlane.xlu0 %724 }
 0x3d5   :  { %2878 = vrsqrt.f32 %v768_v54  ;;  %v754_v2 = vmul.f32 0.03125, %v727_v47  ;;  %v753_v3 = vmul.f32 0.03125, %v725_v51 }
 0x3d6   :  { %2880 = vrsqrt.f32 %v767_v27 }
 0x3d7   :  { %v770_v37 = vadd.f32 1e-05, %v754_v2  ;;  %v769_v45 = vadd.f32 1e-05, %v753_v3  ;;  %v3766_v2 = vld [vmem:[%s4357_s6 + $0x2] ss:$0 sm:$0xff] }
 0x3d8   :  { %v731_v50 = vpop.xlane.xlu1 %730  ;;  %v729_v20 = vpop.xlane.xlu0 %728  ;;  %s3231_s6 = smov [#allocation16]  }
 0x3d9   :  { %2882 = vrsqrt.f32 %v770_v37  ;;  %v756_v4 = vmul.f32 0.03125, %v731_v50  ;;  %v755_v21 = vmul.f32 0.03125, %v729_v20  ;;  %s2354_s4 = sshll.u32 %s3231_s6, 4  ;;  %s2355_s4 = int_to_ptr.vmem [resolvable:$true] %s2354_s4 }
 0x3da   :  { %2884 = vrsqrt.f32 %v769_v45  ;;  %s3164_s21 = scalar_lea.vmem %s2355_s4, 2048  ;;  %p3169_p13 = scmp.lt.s32.totalorder %s2355_s4, %s2355_s4 }
 0x3db   :  { %v772_v22 = vadd.f32 1e-05, %v756_v4  ;;  %v771_v28 = vadd.f32 1e-05, %v755_v21  ;;  %p3165_p12 = scmp.ne.s32.totalorder %s2355_s4, %s3164_s21  ;;  %p3170_p0 = scmp.lt.s32.totalorder %s3164_s21, %s3164_s21 }
 0x3dc   :  { %v735_v1 = vpop.xlane.xlu1 %734  ;;  %v733_v33 = vpop.xlane.xlu0 %732 }
 0x3dd   :  { %2886 = vrsqrt.f32 %v772_v22  ;;  %v758_v39 = vmul.f32 0.03125, %v735_v1  ;;  %v757_v43 = vmul.f32 0.03125, %v733_v33  ;;  %p3171_p1 = por %p3170_p0, %p3169_p13 }
 0x3de   :  { %v2877_v46 = vpop.eup %2876  ;;  %2888 = vrsqrt.f32 %v771_v28 }
 0x3df   :  { %v774_v14 = vadd.f32 1e-05, %v758_v39  ;;  %v773_v30 = vadd.f32 1e-05, %v757_v43  ;;  %v798_v35 = vmul.f32 %v2877_v46, %v3633_v59  ;;  %p3172_p2 = pnand %p3171_p1, %p3165_p12 }
 0x3e0   :  { %v739_v54 = vpop.xlane.xlu1 %738  ;;  %v737_v27 = vpop.xlane.xlu0 %736 }
 0x3e1   :  { %2890 = vrsqrt.f32 %v774_v14  ;;  %v760_v47 = vmul.f32 0.03125, %v739_v54  ;;  %v759_v51 = vmul.f32 0.03125, %v737_v27  ;;  %v818_v3 = vmul.f32 %v3760_v23, %v798_v35 }
 0x3e2   :  { %v2879_v37 = vpop.eup %2878  ;;  %2892 = vrsqrt.f32 %v773_v30 }
 0x3e3   :  { %v2881_v45 = vpop.eup %2880  ;;  %v800_v50 = vmul.f32 %v2879_v37, %v3643_v34  ;;  %v776_v20 = vadd.f32 1e-05, %v760_v47  ;;  %v775_v4 = vadd.f32 1e-05, %v759_v51  ;;  %v838_v28 = vadd.f32 %v3766_v2, %v818_v3 }
 0x3e4   :  { %v743_v59 = vpop.xlane.xlu1 %742  ;;  %v741_v21 = vpop.xlane.xlu0 %740  ;;  %v799_v22 = vmul.f32 %v2881_v45, %v3647_v8 }
 0x3e5   :  { %v820_v1 = vmul.f32 %v3760_v23, %v800_v50  ;;  %2894 = vrsqrt.f32 %v776_v20  ;;  %v762_v33 = vmul.f32 0.03125, %v743_v59  ;;  %v761_v39 = vmul.f32 0.03125, %v741_v21 }
 0x3e6   :  { %v2883_v43 = vpop.eup %2882  ;;  %2896 = vrsqrt.f32 %v775_v4  ;;  %v819_v46 = vmul.f32 %v3760_v23, %v799_v22  ;;  %v854_v51 = vmul.f32 %v838_v28, %v3390_v26 }
 0x3e7   :  { %v2885_v14 = vpop.eup %2884  ;;  %v778_v30 = vadd.f32 1e-05, %v762_v33  ;;  %v777_v34 = vadd.f32 1e-05, %v761_v39  ;;  %v802_v35 = vmul.f32 %v2883_v43, %v3659_v40  ;;  %v840_v45 = vadd.f32 %v3766_v2, %v820_v1 }
 0x3e8   :  { %v801_v54 = vmul.f32 %v2885_v14, %v3663_v11  ;;  %v747_v27 = vpop.xlane.xlu1 %746  ;;  %v745_v8 = vpop.xlane.xlu0 %744  ;;  %v839_v47 = vadd.f32 %v3766_v2, %v819_v46 }
 0x3e9   :  { %2898 = vrsqrt.f32 %v778_v30  ;;  %v764_v3 = vmul.f32 0.03125, %v747_v27  ;;  %v763_v37 = vmul.f32 0.03125, %v745_v8  ;;  %v822_v40 = vmul.f32 %v3760_v23, %v802_v35 }
 0x3ea   :  { %v2887_v50 = vpop.eup %2886  ;;  %v821_v20 = vmul.f32 %v3760_v23, %v801_v54  ;;  %2900 = vrsqrt.f32 %v777_v34  ;;  %v855_v4 = vmul.f32 %v839_v47, %v3406_v32  ;;  %v856_v46 = vmul.f32 %v840_v45, %v3388_v25 }
 0x3eb   :  { %v2889_v11 = vpop.eup %2888  ;;  %v780_v59 = vadd.f32 1e-05, %v764_v3  ;;  %v779_v21 = vadd.f32 1e-05, %v763_v37  ;;  %v804_v22 = vmul.f32 %v2887_v50, %v3675_v16  ;;  %v842_v14 = vadd.f32 %v3766_v2, %v822_v40 }
 0x3ec   :  { %v749_v33 = vpop.xlane.xlu0 %748  ;;  %v870_v28 = vpack.c.bf16 %v855_v4, %v854_v51  ;;  %v841_v39 = vadd.f32 %v3766_v2, %v821_v20  ;;  %v803_v43 = vmul.f32 %v2889_v11, %v3679_v19 }
 0x3ed   :  { %2902 = vrsqrt.f32 %v780_v59  ;;  %v765_v1 = vmul.f32 0.03125, %v749_v33  ;;  %v824_v16 = vmul.f32 %v3760_v23, %v804_v22  ;;  %v858_v45 = vmul.f32 %v842_v14, %v3420_v42 }
 0x3ee   :  { %v2891_v30 = vpop.eup %2890  ;;  %2904 = vrsqrt.f32 %v779_v21  ;;  %2643 = vmatprep.mubr.bf16.mxu0 %v870_v28  ;;  %v857_v34 = vmul.f32 %v841_v39, %v3404_v31  ;;  %v823_v35 = vmul.f32 %v3760_v23, %v803_v43 }
 0x3ef   :  { %v2893_v54 = vpop.eup %2892  ;;  %v781_v27 = vadd.f32 1e-05, %v765_v1  ;;  %v806_v8 = vmul.f32 %v2891_v30, %v3691_v7  ;;  %v844_v4 = vadd.f32 %v3766_v2, %v824_v16 }
 0x3f0   :  { %v871_v19 = vpack.c.bf16 %v857_v34, %v856_v46  ;;  %v843_v47 = vadd.f32 %v3766_v2, %v823_v35  ;;  %v805_v51 = vmul.f32 %v2893_v54, %v3695_v38 }
 0x3f1   :  { %2906 = vrsqrt.f32 %v781_v27  ;;  %v826_v3 = vmul.f32 %v3760_v23, %v806_v8  ;;  %v860_v33 = vmul.f32 %v844_v4, %v3432_v49 }
 0x3f2   :  { %v2895_v37 = vpop.eup %2894  ;;  %2644 = vmatmul.mubr.bf16.vlgmr.msra.gmra.mxu0 %v871_v19  ;;  %v859_v50 = vmul.f32 %v843_v47, %v3418_v41  ;;  %v825_v20 = vmul.f32 %v3760_v23, %v805_v51 }
 0x3f3   :  { %v2897_v40 = vpop.eup %2896  ;;  %v808_v7 = vmul.f32 %v2895_v37, %v3707_v9  ;;  %v846_v21 = vadd.f32 %v3766_v2, %v826_v3 }
 0x3f4   :  { %v872_v11 = vpack.c.bf16 %v859_v50, %v858_v45  ;;  %v845_v59 = vadd.f32 %v3766_v2, %v825_v20  ;;  %v807_v38 = vmul.f32 %v2897_v40, %v3711_v15 }
 0x3f5   :  { %v828_v43 = vmul.f32 %v3760_v23, %v808_v7  ;;  %v862_v30 = vmul.f32 %v846_v21, %v3444_v56 }
 0x3f6   :  { %v2899_v22 = vpop.eup %2898  ;;  %2647 = vmatprep.mubr.bf16.mxu0 %v872_v11  ;;  %v861_v28 = vmul.f32 %v845_v59, %v3430_v48  ;;  %v827_v39 = vmul.f32 %v3760_v23, %v807_v38 }
 0x3f7   :  { %v2901_v1 = vpop.eup %2900  ;;  %v810_v9 = vmul.f32 %v2899_v22, %v3723_v24  ;;  %v848_v54 = vadd.f32 %v3766_v2, %v828_v43 }
 0x3f8   :  { %v873_v46 = vpack.c.bf16 %v861_v28, %v860_v33  ;;  %v847_v14 = vadd.f32 %v3766_v2, %v827_v39  ;;  %v809_v15 = vmul.f32 %v2901_v1, %v3727_v44 }
 0x3f9   :  { %v830_v27 = vmul.f32 %v3760_v23, %v810_v9  ;;  %v864_v37 = vmul.f32 %v848_v54, %v3456_v63 }
 0x3fa   :  { %v2903_v34 = vpop.eup %2902  ;;  %2648 = vmatmul.mubr.bf16.gmra.mxu0 %v873_v46  ;;  %v863_v35 = vmul.f32 %v847_v14, %v3442_v55  ;;  %v829_v16 = vmul.f32 %v3760_v23, %v809_v15 }
 0x3fb   :  { %v2905_v8 = vpop.eup %2904  ;;  %v812_v24 = vmul.f32 %v2903_v34, %v3739_v29  ;;  %v850_v20 = vadd.f32 %v3766_v2, %v830_v27 }
 0x3fc   :  { %v874_v19 = vpack.c.bf16 %v863_v35, %v862_v30  ;;  %v849_v47 = vadd.f32 %v3766_v2, %v829_v16  ;;  %v811_v44 = vmul.f32 %v2905_v8, %v3743_v36 }
 0x3fd   :  { %v832_v51 = vmul.f32 %v3760_v23, %v812_v24  ;;  %v866_v11 = vmul.f32 %v850_v20, %v3468_v6 }
 0x3fe   :  { %v2907_v3 = vpop.eup %2906  ;;  %2651 = vmatprep.mubr.bf16.mxu0 %v874_v19  ;;  %v865_v45 = vmul.f32 %v849_v47, %v3454_v62  ;;  %v831_v50 = vmul.f32 %v3760_v23, %v811_v44 }
 0x3ff   :  { %v813_v4 = vmul.f32 %v2907_v3, %v3753_v10  ;;  %v852_v36 = vadd.f32 %v3766_v2, %v832_v51 }
 0x400   :  { %v875_v29 = vpack.c.bf16 %v865_v45, %v864_v37  ;;  %v851_v40 = vadd.f32 %v3766_v2, %v831_v50 }
 0x401   :  { %v833_v7 = vmul.f32 %v3760_v23, %v813_v4  ;;  %v868_v22 = vmul.f32 %v852_v36, %v3480_v13 }
 0x402   :  { %2652 = vmatmul.mubr.bf16.gmra.mxu0 %v875_v29  ;;  %v867_v59 = vmul.f32 %v851_v40, %v3466_v5  ;;  %v3841_v40 = vld [vmem:[#allocation10] ss:$0 sm:$0xff] }
 0x403   :  { %v853_v38 = vadd.f32 %v3766_v2, %v833_v7 }
 0x404   :  { %v876_v21 = vpack.c.bf16 %v867_v59, %v866_v11 }
 0x405   :  { %v869_v33 = vmul.f32 %v853_v38, %v3478_v12 }
 0x406   :  { %2655 = vmatprep.mubr.bf16.mxu0 %v876_v21 }
 0x407   :  { %v877_v10 = vpack.c.bf16 %v869_v33, %v868_v22 }
 0x40a   :  { %2656 = vmatmul.mubr.bf16.gmra.mxu0 %v877_v10 }
 0x4b2   :  { %v2645_v28 = vpop.f32.mrf.mxu0 }
 0x4b4   :  { %v976_v39 = vpop.f32.mrf.mxu0 }
 0x4b6   :  { %v2646_v23 = vpop.f32.mrf.mxu0 }
 0x4b7   :  { %v1040_v3 = vpack.c.bf16 %v2646_v23, %v2645_v28 }
 0x4b8   :  { %v979_v43 = vpop.f32.mrf.mxu0 }
 0x4b9   :  { %v1039_v37 = vpack.c.bf16 %v979_v43, %v976_v39 }
 0x4ba   :  { %v2649_v1 = vpop.f32.mrf.mxu0 }
 0x4bc   :  { %v992_v9 = vpop.f32.mrf.mxu0 }
 0x4be   :  { %v2650_v46 = vpop.f32.mrf.mxu0 }
 0x4bf   :  { %v1042_v44 = vpack.c.bf16 %v2650_v46, %v2649_v1 }
 0x4c0   :  { %v995_v14 = vpop.f32.mrf.mxu0 }
 0x4c1   :  { %v1041_v51 = vpack.c.bf16 %v995_v14, %v992_v9 }
 0x4c2   :  { %v2653_v15 = vpop.f32.mrf.mxu0 }
 0x4c4   :  { %v1008_v30 = vpop.f32.mrf.mxu0 }
 0x4c6   :  { %v2654_v34 = vpop.f32.mrf.mxu0 }
 0x4c7   :  { %v1044_v19 = vpack.c.bf16 %v2654_v34, %v2653_v15 }
 0x4c8   :  { %v1011_v2 = vpop.f32.mrf.mxu0 }
 0x4c9   :  { %v1043_v47 = vpack.c.bf16 %v1011_v2, %v1008_v30 }
 0x4ca   :  { %v2657_v35 = vpop.f32.mrf.mxu0 }
 0x4cc   :  { %v1024_v16 = vpop.f32.mrf.mxu0 }
 0x4ce   :  { %v2658_v54 = vpop.f32.mrf.mxu0 }
 0x4cf   :  { %v1046_v27 = vpack.c.bf16 %v2658_v54, %v2657_v35 }
 0x4d0   :  { %v1027_v8 = vpop.f32.mrf.mxu0 }
 0x4d1   :  { %v1045_v24 = vpack.c.bf16 %v1027_v8, %v1024_v16  ;;  %2659 = vmatprep.subr.bf16.mxu1 %v1046_v27 }
 0x4d2   :  { %2660 = vmatpush3.bf16.msra.mxu1 %v1046_v27 }
 0x4d3   :  { %2661 = vmatprep.subr.bf16.mxu1 %v1045_v24 }
 0x4d6   :  { %2662 = vmatpush3.bf16.msra.mxu1 %v1045_v24 }
 0x4d7   :  { %2663 = vmatprep.subr.bf16.mxu1 %v1044_v19 }
 0x4da   :  { %2664 = vmatpush3.bf16.msra.mxu1 %v1044_v19 }
 0x4db   :  { %2665 = vmatprep.subr.bf16.mxu1 %v1043_v47 }
 0x4de   :  { %2666 = vmatpush3.bf16.msra.mxu1 %v1043_v47 }
 0x4df   :  { %2667 = vmatprep.subr.bf16.mxu1 %v1042_v44 }
 0x4e2   :  { %2668 = vmatpush3.bf16.msra.mxu1 %v1042_v44 }
 0x4e3   :  { %2669 = vmatprep.subr.bf16.mxu1 %v1041_v51 }
 0x4e6   :  { %2670 = vmatpush3.bf16.msra.mxu1 %v1041_v51 }
 0x4e7   :  { %2671 = vmatprep.subr.bf16.mxu1 %v1040_v3 }
 0x4ea   :  { %2672 = vmatpush3.bf16.msra.mxu1 %v1040_v3 }
 0x4eb   :  { %2673 = vmatprep.subr.bf16.mxu1 %v1039_v37 }
 0x4ee   :  { %2674 = vmatpush3.bf16.msra.mxu1 %v1039_v37 }
 0x4f1   :  { %2676 = vmatmul.mubr.bf16.vlgmr.msra.gmra.mxu1 %v3487_v52 }
 0x4f2   :  { %2679 = vmatprep.mubr.bf16.mxu1 %v3489_v53 }
 0x4f9   :  { %2680 = vmatmul.mubr.bf16.gmra.mxu1 %v3493_v57 }
 0x4fa   :  { %2683 = vmatprep.mubr.bf16.mxu1 %v3495_v58 }
 0x501   :  { %2684 = vmatmul.mubr.bf16.gmra.mxu1 %v3499_v60 }
 0x502   :  { %2687 = vmatprep.mubr.bf16.mxu1 %v3501_v61 }
 0x509   :  { %2688 = vmatmul.mubr.bf16.gmra.mxu1 %v3505_v0 }
 0x50a   :  { %2739 = vmatprep.mubr.bf16.mxu1 %v3484_v18 }
 0x5b1   :  { %v2677_v45 = vpop.f32.mrf.mxu1 }
 0x5b2   :  { %v1146_v20 = vmul.f32 %v2677_v45, %v3388_v25 }
 0x5b3   :  { %v1081_v50 = vpop.f32.mrf.mxu1 }
 0x5b4   :  { %v1144_v4 = vmul.f32 %v1081_v50, %v3390_v26  ;;  %v3850_v18 = vadd.f32 %v3841_v40, %v1146_v20 }
 0x5b5   :  { %v2678_v29 = vpop.f32.mrf.mxu1 }
 0x5b6   :  { %v3844_v7 = vadd.f32 %v3841_v40, %v1144_v4  ;;  %v1147_v11 = vmul.f32 %v2678_v29, %v3404_v31  ;;  %v1185_v39 = vmax.f32 %v3850_v18, 0.0 }
 0x5b7   :  { %v1084_v36 = vpop.f32.mrf.mxu1 }
 0x5b8   :  { %v1145_v59 = vmul.f32 %v1084_v36, %v3406_v32  ;;  %v1183_v38 = vmax.f32 %v3844_v7, 0.0  ;;  %v3862_v43 = vadd.f32 %v3841_v40, %v1147_v11 }
 0x5b9   :  { %v2681_v21 = vpop.f32.mrf.mxu1 }
 0x5ba   :  { %1199 = vadd.xlane.f32.xlu1 %v1183_v38  ;;  %v3855_v22 = vadd.f32 %v3841_v40, %v1145_v59  ;;  %v1150_v33 = vmul.f32 %v2681_v21, %v3432_v49  ;;  %v1186_v34 = vmax.f32 %v3862_v43, 0.0 }
 0x5bb   :  { %v1097_v10 = vpop.f32.mrf.mxu1 }
 0x5bc   :  { %v1148_v28 = vmul.f32 %v1097_v10, %v3420_v42  ;;  %v1184_v23 = vmax.f32 %v3855_v22, 0.0  ;;  %v3872_v14 = vadd.f32 %v3841_v40, %v1150_v33 }
 0x5bd   :  { %v2682_v1 = vpop.f32.mrf.mxu1 }
 0x5be   :  { %1203 = vadd.xlane.f32.xlu1 %v1185_v39  ;;  %1201 = vadd.xlane.f32.xlu0 %v1184_v23  ;;  %v3869_v9 = vadd.f32 %v3841_v40, %v1148_v28  ;;  %v1151_v15 = vmul.f32 %v2682_v1, %v3430_v48  ;;  %v1189_v27 = vmax.f32 %v3872_v14, 0.0 }
 0x5bf   :  { %v1100_v46 = vpop.f32.mrf.mxu1 }
 0x5c0   :  { %v1149_v30 = vmul.f32 %v1100_v46, %v3418_v41  ;;  %v1187_v2 = vmax.f32 %v3869_v9, 0.0  ;;  %v3890_v47 = vadd.f32 %v3841_v40, %v1151_v15 }
 0x5c1   :  { %v2685_v35 = vpop.f32.mrf.mxu1 }
 0x5c2   :  { %1205 = vadd.xlane.f32.xlu0 %v1186_v34  ;;  %1207 = vadd.xlane.f32.xlu1 %v1187_v2  ;;  %v3883_v16 = vadd.f32 %v3841_v40, %v1149_v30  ;;  %v1154_v8 = vmul.f32 %v2685_v35, %v3456_v63  ;;  %v1190_v50 = vmax.f32 %v3890_v47, 0.0 }
 0x5c3   :  { %v1113_v54 = vpop.f32.mrf.mxu1 }
 0x5c4   :  { %v1152_v24 = vmul.f32 %v1113_v54, %v3444_v56  ;;  %v1188_v19 = vmax.f32 %v3883_v16, 0.0  ;;  %v3904_v4 = vadd.f32 %v3841_v40, %v1154_v8 }
 0x5c5   :  { %v2686_v44 = vpop.f32.mrf.mxu1 }
 0x5c6   :  { %1211 = vadd.xlane.f32.xlu1 %v1189_v27  ;;  %1209 = vadd.xlane.f32.xlu0 %v1188_v19  ;;  %v3897_v51 = vadd.f32 %v3841_v40, %v1152_v24  ;;  %v1155_v3 = vmul.f32 %v2686_v44, %v3454_v62  ;;  %v1193_v10 = vmax.f32 %v3904_v4, 0.0  ;;  %v2853_v4 = vld [vmem:[#allocation8 + $0x30] sm:$0xff]  }
 0x5c7   :  { %v1116_v37 = vpop.f32.mrf.mxu1 }
 0x5c8   :  { %v1153_v45 = vmul.f32 %v1116_v37, %v3442_v55  ;;  %v1191_v20 = vmax.f32 %v3897_v51, 0.0  ;;  %v3914_v59 = vadd.f32 %v3841_v40, %v1155_v3 }
 0x5c9   :  { %v2689_v29 = vpop.f32.mrf.mxu1 }
 0x5ca   :  { %1213 = vadd.xlane.f32.xlu0 %v1190_v50  ;;  %1215 = vadd.xlane.f32.xlu1 %v1191_v20  ;;  %v3911_v36 = vadd.f32 %v3841_v40, %v1153_v45  ;;  %v1158_v21 = vmul.f32 %v2689_v29, %v3480_v13  ;;  %v1194_v30 = vmax.f32 %v3914_v59, 0.0  ;;  %v2854_v59 = vld [vmem:[#allocation8 + $0x28] sm:$0xff]  }
 0x5cb   :  { %v1129_v11 = vpop.f32.mrf.mxu1 }
 0x5cc   :  { %v1156_v33 = vmul.f32 %v1129_v11, %v3468_v6  ;;  %v1192_v28 = vmax.f32 %v3911_v36, 0.0  ;;  %v3932_v24 = vadd.f32 %v3841_v40, %v1158_v21 }
 0x5cd   :  { %v2690_v1 = vpop.f32.mrf.mxu1 }
 0x5ce   :  { %1219 = vadd.xlane.f32.xlu1 %v1193_v10  ;;  %1217 = vadd.xlane.f32.xlu0 %v1192_v28  ;;  %v3925_v46 = vadd.f32 %v3841_v40, %v1156_v33  ;;  %v1159_v35 = vmul.f32 %v2690_v1, %v3478_v12  ;;  %v4369_v3 = vmax.f32 %v3932_v24, 0.0 }
 0x5cf   :  { %v1132_v15 = vpop.f32.mrf.mxu1 }
 0x5d0   :  { %v1157_v54 = vmul.f32 %v1132_v15, %v3466_v5  ;;  %v1195_v8 = vmax.f32 %v3925_v46, 0.0  ;;  %v3944_v45 = vadd.f32 %v3841_v40, %v1159_v35 }
 0x5d2   :  { %1221 = vadd.xlane.f32.xlu0 %v1194_v30  ;;  %1223 = vadd.xlane.f32.xlu1 %v1195_v8  ;;  %v3939_v44 = vadd.f32 %v3841_v40, %v1157_v54  ;;  %v4370_v29 = vmax.f32 %v3944_v45, 0.0 }
 0x5d4   :  { %v4368_v37 = vmax.f32 %v3939_v44, 0.0 }
 0x5d6   :  { %1227 = vadd.xlane.f32.xlu1 %v4369_v3  ;;  %1225 = vadd.xlane.f32.xlu0 %v4368_v37 }
 0x5da   :  { %1229 = vadd.xlane.f32.xlu0 %v4370_v29 }
 0x643   :  { %v1200_v11 = vpop.xlane.xlu1 %1199 }
 0x644   :  { %v1231_v21 = vmul.f32 0.03125, %v1200_v11 }
 0x646   :  { %v1247_v33 = vsub.f32 %v1183_v38, %v1231_v21 }
 0x647   :  { %v1204_v1 = vpop.xlane.xlu1 %1203  ;;  %v1202_v15 = vpop.xlane.xlu0 %1201 }
 0x648   :  { %v1233_v40 = vmul.f32 0.03125, %v1204_v1  ;;  %v1232_v35 = vmul.f32 0.03125, %v1202_v15  ;;  %v3957_v54 = vsel %vm619_vm0, %v1247_v33, 0.0 }
 0x649   :  { %v1279_v37 = vmul.f32 %v3957_v54, %v3957_v54 }
 0x64a   :  { %v1249_v3 = vsub.f32 %v1185_v39, %v1233_v40  ;;  %v1248_v11 = vsub.f32 %v1184_v23, %v1232_v35 }
 0x64b   :  { %v1206_v29 = vpop.xlane.xlu0 %1205  ;;  %v1208_v7 = vpop.xlane.xlu1 %1207  ;;  %1295 = vadd.xlane.f32.xlu1 %v1279_v37 }
 0x64c   :  { %v1234_v38 = vmul.f32 0.03125, %v1206_v29  ;;  %v1235_v21 = vmul.f32 0.03125, %v1208_v7  ;;  %v3967_v1 = vsel %vm619_vm0, %v1249_v3, 0.0  ;;  %v3971_v33 = vsel %vm619_vm0, %v1248_v11, 0.0 }
 0x64d   :  { %v1281_v18 = vmul.f32 %v3967_v1, %v3967_v1  ;;  %v1280_v22 = vmul.f32 %v3971_v33, %v3971_v33 }
 0x64e   :  { %v1250_v39 = vsub.f32 %v1186_v34, %v1234_v38  ;;  %v1251_v23 = vsub.f32 %v1187_v2, %v1235_v21 }
 0x64f   :  { %v1212_v37 = vpop.xlane.xlu1 %1211  ;;  %v1210_v29 = vpop.xlane.xlu0 %1209  ;;  %1299 = vadd.xlane.f32.xlu1 %v1281_v18  ;;  %1297 = vadd.xlane.f32.xlu0 %v1280_v22 }
 0x650   :  { %v1237_v3 = vmul.f32 0.03125, %v1212_v37  ;;  %v1236_v15 = vmul.f32 0.03125, %v1210_v29  ;;  %v3983_v40 = vsel %vm619_vm0, %v1251_v23, 0.0  ;;  %v3987_v35 = vsel %vm619_vm0, %v1250_v39, 0.0 }
 0x651   :  { %v1283_v43 = vmul.f32 %v3983_v40, %v3983_v40  ;;  %v1282_v9 = vmul.f32 %v3987_v35, %v3987_v35 }
 0x652   :  { %v1253_v34 = vsub.f32 %v1189_v27, %v1237_v3  ;;  %v1252_v2 = vsub.f32 %v1188_v19, %v1236_v15 }
 0x653   :  { %v1214_v11 = vpop.xlane.xlu0 %1213  ;;  %v1216_v7 = vpop.xlane.xlu1 %1215  ;;  %1303 = vadd.xlane.f32.xlu1 %v1283_v43  ;;  %1301 = vadd.xlane.f32.xlu0 %v1282_v9  ;;  %v2852_v43 = vld [vmem:[#allocation8 + $0x38] sm:$0xff]  }
 0x654   :  { %v1238_v38 = vmul.f32 0.03125, %v1214_v11  ;;  %v1239_v21 = vmul.f32 0.03125, %v1216_v7  ;;  %v3999_v18 = vsel %vm619_vm0, %v1253_v34, 0.0  ;;  %v4003_v22 = vsel %vm619_vm0, %v1252_v2, 0.0  ;;  %2691 = vmatprep.subr.bf16.mxu0 %v2852_v43 }
 0x655   :  { %v1285_v14 = vmul.f32 %v3999_v18, %v3999_v18  ;;  %v1284_v16 = vmul.f32 %v4003_v22, %v4003_v22  ;;  %2692 = vmatpush3.bf16.msra.mxu0 %v2852_v43 }
 0x656   :  { %v1254_v27 = vsub.f32 %v1190_v50, %v1238_v38  ;;  %v1255_v19 = vsub.f32 %v1191_v20, %v1239_v21  ;;  %2693 = vmatprep.subr.bf16.mxu0 %v2853_v4 }
 0x657   :  { %v1220_v39 = vpop.xlane.xlu1 %1219  ;;  %v1218_v23 = vpop.xlane.xlu0 %1217  ;;  %1307 = vadd.xlane.f32.xlu1 %v1285_v14  ;;  %1305 = vadd.xlane.f32.xlu0 %v1284_v16 }
 0x658   :  { %v1241_v37 = vmul.f32 0.03125, %v1220_v39  ;;  %v1240_v29 = vmul.f32 0.03125, %v1218_v23  ;;  %v4015_v3 = vsel %vm619_vm0, %v1255_v19, 0.0  ;;  %v4019_v15 = vsel %vm619_vm0, %v1254_v27, 0.0 }
 0x659   :  { %v1287_v47 = vmul.f32 %v4015_v3, %v4015_v3  ;;  %v1286_v51 = vmul.f32 %v4019_v15, %v4019_v15  ;;  %2694 = vmatpush3.bf16.msra.mxu0 %v2853_v4  ;;  %v2856_v4 = vld [vmem:[#allocation8 + $0x18] sm:$0xff]  }
 0x65a   :  { %v1257_v50 = vsub.f32 %v1193_v10, %v1241_v37  ;;  %v1256_v20 = vsub.f32 %v1192_v28, %v1240_v29  ;;  %v4376_v29 = vmax.f32 %v3939_v44, 0.0  ;;  %2695 = vmatprep.subr.bf16.mxu0 %v2854_v59 }
 0x65b   :  { %v1222_v9 = vpop.xlane.xlu0 %1221  ;;  %1311 = vadd.xlane.f32.xlu1 %v1287_v47  ;;  %v1224_v34 = vpop.xlane.xlu1 %1223  ;;  %1309 = vadd.xlane.f32.xlu0 %v1286_v51 }
 0x65c   :  { %v1242_v2 = vmul.f32 0.03125, %v1222_v9  ;;  %v1243_v11 = vmul.f32 0.03125, %v1224_v34  ;;  %v4031_v7 = vsel %vm619_vm0, %v1257_v50, 0.0  ;;  %v4035_v38 = vsel %vm619_vm0, %v1256_v20, 0.0  ;;  %v2855_v9 = vld [vmem:[#allocation8 + $0x20] sm:$0xff]  }
 0x65d   :  { %v1289_v36 = vmul.f32 %v4031_v7, %v4031_v7  ;;  %v1288_v10 = vmul.f32 %v4035_v38, %v4035_v38  ;;  %2696 = vmatpush3.bf16.msra.mxu0 %v2854_v59  ;;  %v4377_v34 = vmax.f32 %v3944_v45, 0.0  ;;  %v2858_v45 = vld [vmem:[#allocation8 + $0x8] sm:$0xff]  }
 0x65e   :  { %v1258_v28 = vsub.f32 %v1194_v30, %v1242_v2  ;;  %v1259_v21 = vsub.f32 %v1195_v8, %v1243_v11  ;;  %v4375_v8 = vmax.f32 %v3932_v24, 0.0  ;;  %2697 = vmatprep.subr.bf16.mxu0 %v2855_v9 }
 0x65f   :  { %1315 = vadd.xlane.f32.xlu1 %v1289_v36  ;;  %v1228_v14 = vpop.xlane.xlu1 %1227  ;;  %1313 = vadd.xlane.f32.xlu0 %v1288_v10  ;;  %v1226_v16 = vpop.xlane.xlu0 %1225  ;;  %v2857_v10 = vld [vmem:[#allocation8 + $0x10] sm:$0xff]  }
 0x660   :  { %v1245_v27 = vmul.f32 0.03125, %v1228_v14  ;;  %v1244_v19 = vmul.f32 0.03125, %v1226_v16  ;;  %v4047_v39 = vsel %vm619_vm0, %v1259_v21, 0.0  ;;  %v4051_v23 = vsel %vm619_vm0, %v1258_v28, 0.0  ;;  %v2859_v28 = vld [vmem:[#allocation8] sm:$0xff]  }
 0x661   :  { %v1291_v46 = vmul.f32 %v4047_v39, %v4047_v39  ;;  %v1290_v30 = vmul.f32 %v4051_v23, %v4051_v23  ;;  %2698 = vmatpush3.bf16.msra.mxu0 %v2855_v9 }
 0x662   :  { %v1261_v37 = vsub.f32 %v4375_v8, %v1245_v27  ;;  %v1260_v43 = vsub.f32 %v4376_v29, %v1244_v19  ;;  %2699 = vmatprep.subr.bf16.mxu0 %v2856_v4 }
 0x663   :  { %1319 = vadd.xlane.f32.xlu1 %v1291_v46  ;;  %1317 = vadd.xlane.f32.xlu0 %v1290_v30  ;;  %v1230_v47 = vpop.xlane.xlu0 %1229 }
 0x664   :  { %v1246_v51 = vmul.f32 0.03125, %v1230_v47  ;;  %v4063_v50 = vsel %vm619_vm0, %v1261_v37, 0.0  ;;  %v4067_v20 = vsel %vm619_vm0, %v1260_v43, 0.0 }
 0x665   :  { %v1293_v24 = vmul.f32 %v4063_v50, %v4063_v50  ;;  %v1292_v44 = vmul.f32 %v4067_v20, %v4067_v20  ;;  %2700 = vmatpush3.bf16.msra.mxu0 %v2856_v4 }
 0x666   :  { %v1262_v2 = vsub.f32 %v4377_v34, %v1246_v51  ;;  %2701 = vmatprep.subr.bf16.mxu0 %v2857_v10 }
 0x667   :  { %1323 = vadd.xlane.f32.xlu1 %v1293_v24  ;;  %1321 = vadd.xlane.f32.xlu0 %v1292_v44 }
 0x668   :  { %v4077_v11 = vsel %vm619_vm0, %v1262_v2, 0.0 }
 0x669   :  { %v1294_v36 = vmul.f32 %v4077_v11, %v4077_v11  ;;  %2702 = vmatpush3.bf16.msra.mxu0 %v2857_v10 }
 0x66a   :  { %2703 = vmatprep.subr.bf16.mxu0 %v2858_v45 }
 0x66b   :  { %1325 = vadd.xlane.f32.xlu0 %v1294_v36 }
 0x66d   :  { %2704 = vmatpush3.bf16.msra.mxu0 %v2858_v45 }
 0x66e   :  { %2705 = vmatprep.subr.bf16.mxu0 %v2859_v28 }
 0x671   :  { %2706 = vmatpush3.bf16.msra.mxu0 %v2859_v28 }
 0x6d4   :  { %v1296_v21 = vpop.xlane.xlu1 %1295 }
 0x6d5   :  { %v1327_v14 = vmul.f32 0.03125, %v1296_v21 }
 0x6d7   :  { %v1343_v16 = vadd.f32 1e-05, %v1327_v14 }
 0x6d8   :  { %v1300_v27 = vpop.xlane.xlu1 %1299  ;;  %v1298_v19 = vpop.xlane.xlu0 %1297 }
 0x6d9   :  { %2908 = vrsqrt.f32 %v1343_v16  ;;  %v1329_v59 = vmul.f32 0.03125, %v1300_v27  ;;  %v1328_v46 = vmul.f32 0.03125, %v1298_v19  ;;  %v4081_v16 = vld [vmem:[#allocation10 + $0x1] ss:$0 sm:$0xff] }
 0x6db   :  { %v1345_v30 = vadd.f32 1e-05, %v1329_v59  ;;  %v1344_v8 = vadd.f32 1e-05, %v1328_v46 }
 0x6dc   :  { %v1304_v37 = vpop.xlane.xlu1 %1303  ;;  %v1302_v29 = vpop.xlane.xlu0 %1301 }
 0x6dd   :  { %2910 = vrsqrt.f32 %v1345_v30  ;;  %v1331_v43 = vmul.f32 0.03125, %v1304_v37  ;;  %v1330_v47 = vmul.f32 0.03125, %v1302_v29  ;;  %v4084_v29 = vld [vmem:[#allocation10 + $0x2] ss:$0 sm:$0xff] }
 0x6de   :  { %2912 = vrsqrt.f32 %v1344_v8 }
 0x6df   :  { %v1347_v51 = vadd.f32 1e-05, %v1331_v43  ;;  %v1346_v9 = vadd.f32 1e-05, %v1330_v47 }
 0x6e0   :  { %v1308_v24 = vpop.xlane.xlu1 %1307  ;;  %v1306_v44 = vpop.xlane.xlu0 %1305 }
 0x6e1   :  { %2914 = vrsqrt.f32 %v1347_v51  ;;  %v1333_v34 = vmul.f32 0.03125, %v1308_v24  ;;  %v1332_v2 = vmul.f32 0.03125, %v1306_v44 }
 0x6e2   :  { %2916 = vrsqrt.f32 %v1346_v9 }
 0x6e3   :  { %v1349_v4 = vadd.f32 1e-05, %v1333_v34  ;;  %v1348_v36 = vadd.f32 1e-05, %v1332_v2 }
 0x6e4   :  { %v1312_v10 = vpop.xlane.xlu1 %1311  ;;  %v1310_v45 = vpop.xlane.xlu0 %1309 }
 0x6e5   :  { %2918 = vrsqrt.f32 %v1349_v4  ;;  %v1335_v28 = vmul.f32 0.03125, %v1312_v10  ;;  %v1334_v21 = vmul.f32 0.03125, %v1310_v45 }
 0x6e6   :  { %v2909_v14 = vpop.eup %2908  ;;  %2920 = vrsqrt.f32 %v1348_v36 }
 0x6e7   :  { %v1351_v27 = vadd.f32 1e-05, %v1335_v28  ;;  %v1350_v19 = vadd.f32 1e-05, %v1334_v21  ;;  %v1375_v59 = vmul.f32 %v2909_v14, %v3957_v54 }
 0x6e8   :  { %v1316_v46 = vpop.xlane.xlu1 %1315  ;;  %v1314_v30 = vpop.xlane.xlu0 %1313 }
 0x6e9   :  { %2922 = vrsqrt.f32 %v1351_v27  ;;  %v1337_v8 = vmul.f32 0.03125, %v1316_v46  ;;  %v1336_v37 = vmul.f32 0.03125, %v1314_v30  ;;  %v1395_v43 = vmul.f32 %v4081_v16, %v1375_v59 }
 0x6ea   :  { %v2911_v47 = vpop.eup %2910  ;;  %2924 = vrsqrt.f32 %v1350_v19 }
 0x6eb   :  { %v2913_v51 = vpop.eup %2912  ;;  %v1377_v9 = vmul.f32 %v2911_v47, %v3967_v1  ;;  %v1353_v24 = vadd.f32 1e-05, %v1337_v8  ;;  %v1352_v44 = vadd.f32 1e-05, %v1336_v37  ;;  %v1415_v4 = vadd.f32 %v4084_v29, %v1395_v43 }
 0x6ec   :  { %v1320_v34 = vpop.xlane.xlu1 %1319  ;;  %v1318_v2 = vpop.xlane.xlu0 %1317  ;;  %v1376_v54 = vmul.f32 %v2913_v51, %v3971_v33 }
 0x6ed   :  { %v1397_v36 = vmul.f32 %v4081_v16, %v1377_v9  ;;  %2926 = vrsqrt.f32 %v1353_v24  ;;  %v1339_v10 = vmul.f32 0.03125, %v1320_v34  ;;  %v1338_v45 = vmul.f32 0.03125, %v1318_v2 }
 0x6ee   :  { %v2915_v28 = vpop.eup %2914  ;;  %2928 = vrsqrt.f32 %v1352_v44  ;;  %v1396_v21 = vmul.f32 %v4081_v16, %v1376_v54  ;;  %v1431_v8 = vmul.f32 %v1415_v4, %v3390_v26 }
 0x6ef   :  { %v2917_v14 = vpop.eup %2916  ;;  %v1355_v27 = vadd.f32 1e-05, %v1339_v10  ;;  %v1354_v1 = vadd.f32 1e-05, %v1338_v45  ;;  %v1379_v19 = vmul.f32 %v2915_v28, %v3983_v40  ;;  %v1417_v47 = vadd.f32 %v4084_v29, %v1397_v36 }
 0x6f0   :  { %v1378_v59 = vmul.f32 %v2917_v14, %v3987_v35  ;;  %v1324_v46 = vpop.xlane.xlu1 %1323  ;;  %v1322_v33 = vpop.xlane.xlu0 %1321  ;;  %v1416_v30 = vadd.f32 %v4084_v29, %v1396_v21 }
 0x6f1   :  { %2930 = vrsqrt.f32 %v1355_v27  ;;  %v1341_v37 = vmul.f32 0.03125, %v1324_v46  ;;  %v1340_v43 = vmul.f32 0.03125, %v1322_v33  ;;  %v1399_v40 = vmul.f32 %v4081_v16, %v1379_v19 }
 0x6f2   :  { %v2919_v51 = vpop.eup %2918  ;;  %v1398_v9 = vmul.f32 %v4081_v16, %v1378_v59  ;;  %2932 = vrsqrt.f32 %v1354_v1  ;;  %v1432_v24 = vmul.f32 %v1416_v30, %v3406_v32  ;;  %v1433_v28 = vmul.f32 %v1417_v47, %v3388_v25 }
 0x6f3   :  { %v2921_v35 = vpop.eup %2920  ;;  %v1357_v44 = vadd.f32 1e-05, %v1341_v37  ;;  %v1356_v34 = vadd.f32 1e-05, %v1340_v43  ;;  %v1381_v2 = vmul.f32 %v2919_v51, %v3999_v18  ;;  %v1419_v21 = vadd.f32 %v4084_v29, %v1399_v40 }
 0x6f4   :  { %v1326_v54 = vpop.xlane.xlu0 %1325  ;;  %v1447_v4 = vpack.c.bf16 %v1432_v24, %v1431_v8  ;;  %v1418_v10 = vadd.f32 %v4084_v29, %v1398_v9  ;;  %v1380_v45 = vmul.f32 %v2921_v35, %v4003_v22 }
 0x6f5   :  { %2934 = vrsqrt.f32 %v1357_v44  ;;  %v1342_v36 = vmul.f32 0.03125, %v1326_v54  ;;  %v1401_v18 = vmul.f32 %v4081_v16, %v1381_v2  ;;  %v1435_v43 = vmul.f32 %v1419_v21, %v3420_v42 }
 0x6f6   :  { %v2923_v14 = vpop.eup %2922  ;;  %2936 = vrsqrt.f32 %v1356_v34  ;;  %2707 = vmatprep.mubr.bf16.mxu0 %v1447_v4  ;;  %v1434_v27 = vmul.f32 %v1418_v10, %v3404_v31  ;;  %v1400_v1 = vmul.f32 %v4081_v16, %v1380_v45 }
 0x6f7   :  { %v2925_v19 = vpop.eup %2924  ;;  %v1358_v59 = vadd.f32 1e-05, %v1342_v36  ;;  %v1383_v46 = vmul.f32 %v2923_v14, %v4015_v3  ;;  %v1421_v9 = vadd.f32 %v4084_v29, %v1401_v18 }
 0x6f8   :  { %v1448_v22 = vpack.c.bf16 %v1434_v27, %v1433_v28  ;;  %v1420_v33 = vadd.f32 %v4084_v29, %v1400_v1  ;;  %v1382_v30 = vmul.f32 %v2925_v19, %v4019_v15 }
 0x6f9   :  { %2938 = vrsqrt.f32 %v1358_v59  ;;  %v1403_v8 = vmul.f32 %v4081_v16, %v1383_v46  ;;  %v1437_v2 = vmul.f32 %v1421_v9, %v3432_v49 }
 0x6fa   :  { %v2927_v37 = vpop.eup %2926  ;;  %2708 = vmatmul.mubr.bf16.vlgmr.msra.gmra.mxu0 %v1448_v22  ;;  %v1436_v47 = vmul.f32 %v1420_v33, %v3418_v41  ;;  %v1402_v51 = vmul.f32 %v4081_v16, %v1382_v30 }
 0x6fb   :  { %v2929_v24 = vpop.eup %2928  ;;  %v1385_v3 = vmul.f32 %v2927_v37, %v4031_v7  ;;  %v1423_v44 = vadd.f32 %v4084_v29, %v1403_v8 }
 0x6fc   :  { %v1449_v40 = vpack.c.bf16 %v1436_v47, %v1435_v43  ;;  %v1422_v35 = vadd.f32 %v4084_v29, %v1402_v51  ;;  %v1384_v15 = vmul.f32 %v2929_v24, %v4035_v38 }
 0x6fd   :  { %v1405_v10 = vmul.f32 %v4081_v16, %v1385_v3  ;;  %v1439_v21 = vmul.f32 %v1423_v44, %v3444_v56 }
 0x6fe   :  { %v2931_v34 = vpop.eup %2930  ;;  %2711 = vmatprep.mubr.bf16.mxu0 %v1449_v40  ;;  %v1438_v54 = vmul.f32 %v1422_v35, %v3430_v48  ;;  %v1404_v4 = vmul.f32 %v4081_v16, %v1384_v15 }
 0x6ff   :  { %v2933_v45 = vpop.eup %2932  ;;  %v1387_v7 = vmul.f32 %v2931_v34, %v4047_v39  ;;  %v1425_v18 = vadd.f32 %v4084_v29, %v1405_v10 }
 0x700   :  { %v1450_v36 = vpack.c.bf16 %v1438_v54, %v1437_v2  ;;  %v1424_v28 = vadd.f32 %v4084_v29, %v1404_v4  ;;  %v1386_v38 = vmul.f32 %v2933_v45, %v4051_v23  ;;  %v2860_v2 = vld [vmem:[#allocation13 + $0x38] sm:$0xff]   ;;  %v2861_v54 = vld [vmem:[#allocation13 + $0x30] sm:$0xff]   ;;  %v2863_v4 = vld [vmem:[#allocation13 + $0x20] sm:$0xff]  }
 0x701   :  { %v1407_v19 = vmul.f32 %v4081_v16, %v1387_v7  ;;  %v1441_v8 = vmul.f32 %v1425_v18, %v3456_v63  ;;  %2755 = vmatprep.subr.bf16.mxu0 %v2860_v2 }
 0x702   :  { %v2935_v14 = vpop.eup %2934  ;;  %2712 = vmatmul.mubr.bf16.gmra.mxu0 %v1450_v36  ;;  %v1440_v27 = vmul.f32 %v1424_v28, %v3442_v55  ;;  %v1406_v1 = vmul.f32 %v4081_v16, %v1386_v38 }
 0x703   :  { %v2937_v59 = vpop.eup %2936  ;;  %v1389_v39 = vmul.f32 %v2935_v14, %v4063_v50  ;;  %v1427_v47 = vadd.f32 %v4084_v29, %v1407_v19  ;;  %2756 = vmatpush3.bf16.msra.mxu0 %v2860_v2 }
 0x704   :  { %v1451_v46 = vpack.c.bf16 %v1440_v27, %v1439_v21  ;;  %v1426_v22 = vadd.f32 %v4084_v29, %v1406_v1  ;;  %v1388_v23 = vmul.f32 %v2937_v59, %v4067_v20  ;;  %2757 = vmatprep.subr.bf16.mxu0 %v2861_v54 }
 0x705   :  { %v1409_v33 = vmul.f32 %v4081_v16, %v1389_v39  ;;  %v1443_v3 = vmul.f32 %v1427_v47, %v3468_v6 }
 0x706   :  { %v2939_v30 = vpop.eup %2938  ;;  %2715 = vmatprep.mubr.bf16.mxu0 %v1451_v46  ;;  %v1442_v37 = vmul.f32 %v1426_v22, %v3454_v62  ;;  %v1408_v43 = vmul.f32 %v4081_v16, %v1388_v23 }
 0x707   :  { %v1390_v51 = vmul.f32 %v2939_v30, %v4077_v11  ;;  %v1429_v20 = vadd.f32 %v4084_v29, %v1409_v33  ;;  %2758 = vmatpush3.bf16.msra.mxu0 %v2861_v54 }
 0x708   :  { %v1452_v50 = vpack.c.bf16 %v1442_v37, %v1441_v8  ;;  %v1428_v9 = vadd.f32 %v4084_v29, %v1408_v43 }
 0x709   :  { %v1410_v24 = vmul.f32 %v4081_v16, %v1390_v51  ;;  %v1445_v44 = vmul.f32 %v1429_v20, %v3480_v13  ;;  %v2862_v16 = vld [vmem:[#allocation13 + $0x28] sm:$0xff]   ;;  %v2864_v51 = vld [vmem:[#allocation13 + $0x18] sm:$0xff]  }
 0x70a   :  { %2716 = vmatmul.mubr.bf16.gmra.mxu0 %v1452_v50  ;;  %v1444_v40 = vmul.f32 %v1428_v9, %v3466_v5  ;;  %2759 = vmatprep.subr.bf16.mxu0 %v2862_v16  ;;  %v2865_v50 = vld [vmem:[#allocation13 + $0x10] sm:$0xff]   ;;  %v2866_v9 = vld [vmem:[#allocation13 + $0x8] sm:$0xff]  }
 0x70b   :  { %v1430_v35 = vadd.f32 %v4084_v29, %v1410_v24  ;;  %2760 = vmatpush3.bf16.msra.mxu0 %v2862_v16  ;;  %v4156_v24 = vld [vmem:[#allocation11] ss:$0 sm:$0xff] }
 0x70c   :  { %v1453_v15 = vpack.c.bf16 %v1444_v40, %v1443_v3  ;;  %2761 = vmatprep.subr.bf16.mxu0 %v2863_v4 }
 0x70d   :  { %v1446_v34 = vmul.f32 %v1430_v35, %v3478_v12 }
 0x70e   :  { %2719 = vmatprep.mubr.bf16.mxu0 %v1453_v15 }
 0x70f   :  { %v1454_v11 = vpack.c.bf16 %v1446_v34, %v1445_v44  ;;  %2762 = vmatpush3.bf16.msra.mxu0 %v2863_v4 }
 0x710   :  { %2763 = vmatprep.subr.bf16.mxu0 %v2864_v51 }
 0x712   :  { %2720 = vmatmul.mubr.bf16.gmra.mxu0 %v1454_v11 }
 0x713   :  { %2764 = vmatpush3.bf16.msra.mxu0 %v2864_v51 }
 0x714   :  { %2765 = vmatprep.subr.bf16.mxu0 %v2865_v50 }
 0x717   :  { %2766 = vmatpush3.bf16.msra.mxu0 %v2865_v50 }
 0x718   :  { %2767 = vmatprep.subr.bf16.mxu0 %v2866_v9 }
 0x71b   :  { %2768 = vmatpush3.bf16.msra.mxu0 %v2866_v9 }
 0x7ba   :  { %v2709_v29 = vpop.f32.mrf.mxu0 }
 0x7bc   :  { %v1553_v10 = vpop.f32.mrf.mxu0 }
 0x7be   :  { %v2710_v45 = vpop.f32.mrf.mxu0 }
 0x7bf   :  { %v1617_v43 = vpack.c.bf16 %v2710_v45, %v2709_v29 }
 0x7c0   :  { %v1556_v7 = vpop.f32.mrf.mxu0 }
 0x7c1   :  { %v1616_v47 = vpack.c.bf16 %v1556_v7, %v1553_v10 }
 0x7c2   :  { %v2713_v36 = vpop.f32.mrf.mxu0 }
 0x7c4   :  { %v1569_v28 = vpop.f32.mrf.mxu0 }
 0x7c6   :  { %v2714_v38 = vpop.f32.mrf.mxu0 }
 0x7c7   :  { %v1619_v8 = vpack.c.bf16 %v2714_v38, %v2713_v36 }
 0x7c8   :  { %v1572_v21 = vpop.f32.mrf.mxu0 }
 0x7c9   :  { %v1618_v37 = vpack.c.bf16 %v1572_v21, %v1569_v28 }
 0x7ca   :  { %v2717_v14 = vpop.f32.mrf.mxu0 }
 0x7cc   :  { %v1585_v27 = vpop.f32.mrf.mxu0 }
 0x7ce   :  { %v2718_v1 = vpop.f32.mrf.mxu0 }
 0x7cf   :  { %v1621_v33 = vpack.c.bf16 %v2718_v1, %v2717_v14 }
 0x7d0   :  { %v1588_v18 = vpop.f32.mrf.mxu0 }
 0x7d1   :  { %v1620_v30 = vpack.c.bf16 %v1588_v18, %v1585_v27 }
 0x7d2   :  { %v2721_v19 = vpop.f32.mrf.mxu0 }
 0x7d4   :  { %v1601_v59 = vpop.f32.mrf.mxu0 }
 0x7d6   :  { %v2722_v39 = vpop.f32.mrf.mxu0 }
 0x7d7   :  { %v1623_v46 = vpack.c.bf16 %v2722_v39, %v2721_v19 }
 0x7d8   :  { %v1604_v22 = vpop.f32.mrf.mxu0 }
 0x7d9   :  { %v1622_v23 = vpack.c.bf16 %v1604_v22, %v1601_v59  ;;  %2723 = vmatprep.subr.bf16.mxu1 %v1623_v46 }
 0x7da   :  { %2724 = vmatpush3.bf16.msra.mxu1 %v1623_v46 }
 0x7db   :  { %2725 = vmatprep.subr.bf16.mxu1 %v1622_v23 }
 0x7de   :  { %2726 = vmatpush3.bf16.msra.mxu1 %v1622_v23 }
 0x7df   :  { %2727 = vmatprep.subr.bf16.mxu1 %v1621_v33 }
 0x7e2   :  { %2728 = vmatpush3.bf16.msra.mxu1 %v1621_v33 }
 0x7e3   :  { %2729 = vmatprep.subr.bf16.mxu1 %v1620_v30 }
 0x7e6   :  { %2730 = vmatpush3.bf16.msra.mxu1 %v1620_v30 }
 0x7e7   :  { %2731 = vmatprep.subr.bf16.mxu1 %v1619_v8 }
 0x7ea   :  { %2732 = vmatpush3.bf16.msra.mxu1 %v1619_v8 }
 0x7eb   :  { %2733 = vmatprep.subr.bf16.mxu1 %v1618_v37 }
 0x7ee   :  { %2734 = vmatpush3.bf16.msra.mxu1 %v1618_v37 }
 0x7ef   :  { %2735 = vmatprep.subr.bf16.mxu1 %v1617_v43 }
 0x7f2   :  { %2736 = vmatpush3.bf16.msra.mxu1 %v1617_v43 }
 0x7f3   :  { %2737 = vmatprep.subr.bf16.mxu1 %v1616_v47 }
 0x7f6   :  { %2738 = vmatpush3.bf16.msra.mxu1 %v1616_v47 }
 0x7f9   :  { %2740 = vmatmul.mubr.bf16.vlgmr.msra.gmra.mxu1 %v3487_v52  ;;  %v2867_v52 = vld [vmem:[#allocation13] sm:$0xff]  }
 0x7fa   :  { %2743 = vmatprep.mubr.bf16.mxu1 %v3489_v53  ;;  %2769 = vmatprep.subr.bf16.mxu0 %v2867_v52  ;;  %v2868_v53 = vld [vmem:[#allocation14 + $0x38] sm:$0xff]  }
 0x7fb   :  { %2770 = vmatpush3.bf16.msra.mxu0 %v2867_v52  ;;  %2787 = vmatprep.subr.bf16.mxu1 %v2868_v53 }
 0x7fc   :  { %2788 = vmatpush3.bf16.msra.mxu1 %v2868_v53 }
 0x801   :  { %2744 = vmatmul.mubr.bf16.gmra.mxu1 %v3493_v57  ;;  %v2869_v57 = vld [vmem:[#allocation14 + $0x30] sm:$0xff]  }
 0x802   :  { %2747 = vmatprep.mubr.bf16.mxu1 %v3495_v58  ;;  %2789 = vmatprep.subr.bf16.mxu1 %v2869_v57  ;;  %v2870_v58 = vld [vmem:[#allocation14 + $0x28] sm:$0xff]  }
 0x803   :  { %2790 = vmatpush3.bf16.msra.mxu1 %v2869_v57 }
 0x804   :  { %2791 = vmatprep.subr.bf16.mxu1 %v2870_v58 }
 0x807   :  { %2792 = vmatpush3.bf16.msra.mxu1 %v2870_v58 }
 0x809   :  { %2748 = vmatmul.mubr.bf16.gmra.mxu1 %v3499_v60  ;;  %v2871_v60 = vld [vmem:[#allocation14 + $0x20] sm:$0xff]  }
 0x80a   :  { %2751 = vmatprep.mubr.bf16.mxu1 %v3501_v61  ;;  %2793 = vmatprep.subr.bf16.mxu1 %v2871_v60  ;;  %v2872_v61 = vld [vmem:[#allocation14 + $0x18] sm:$0xff]  }
 0x80b   :  { %2794 = vmatpush3.bf16.msra.mxu1 %v2871_v60 }
 0x80c   :  { %2795 = vmatprep.subr.bf16.mxu1 %v2872_v61 }
 0x80f   :  { %2796 = vmatpush3.bf16.msra.mxu1 %v2872_v61 }
 0x811   :  { %2752 = vmatmul.mubr.bf16.gmra.mxu1 %v3505_v0 }
 0x8b9   :  { %v2741_v0 = vpop.f32.mrf.mxu1 }
 0x8ba   :  { %v1723_v20 = vmul.f32 %v2741_v0, %v3388_v25 }
 0x8bb   :  { %v1658_v3 = vpop.f32.mrf.mxu1 }
 0x8bc   :  { %v1744_v40 = vadd.f32 %v4156_v24, %v1723_v20  ;;  %v1721_v35 = vmul.f32 %v1658_v3, %v3390_v26 }
 0x8bd   :  { %v2742_v15 = vpop.f32.mrf.mxu1 }
 0x8be   :  { %1760 = vst [vmem:[#allocation16 + $0x10] sm:$0xff] %v1744_v40  ;;  %v1742_v44 = vadd.f32 %v4156_v24, %v1721_v35  ;;  %v1724_v34 = vmul.f32 %v2742_v15, %v3404_v31  ;;  %v1776_v36 = vmax.f32 %v1744_v40, 0.0 }
 0x8bf   :  { %v1661_v11 = vpop.f32.mrf.mxu1 }
 0x8c0   :  { %1758 = vst [vmem:[#allocation16] sm:$0xff] %v1742_v44  ;;  %v1745_v2 = vadd.f32 %v4156_v24, %v1724_v34  ;;  %v1722_v54 = vmul.f32 %v1661_v11, %v3406_v32  ;;  %v1774_v10 = vmax.f32 %v1742_v44, 0.0 }
 0x8c1   :  { %v2745_v16 = vpop.f32.mrf.mxu1 }
 0x8c2   :  { %1761 = vst [vmem:[#allocation16 + $0x18] sm:$0xff] %v1745_v2  ;;  %v1743_v25 = vadd.f32 %v4156_v24, %v1722_v54  ;;  %v1727_v4 = vmul.f32 %v2745_v16, %v3432_v49  ;;  %v1777_v29 = vmax.f32 %v1745_v2, 0.0  ;;  %v2873_v16 = vld [vmem:[#allocation14 + $0x10] sm:$0xff]  }
 0x8c3   :  { %v1674_v26 = vpop.f32.mrf.mxu1  ;;  %2797 = vmatprep.subr.bf16.mxu1 %v2873_v16 }
 0x8c4   :  { %1759 = vst [vmem:[#allocation16 + $0x8] sm:$0xff] %v1743_v25  ;;  %v1775_v45 = vmax.f32 %v1743_v25, 0.0  ;;  %v1748_v7 = vadd.f32 %v4156_v24, %v1727_v4  ;;  %v1725_v31 = vmul.f32 %v1674_v26, %v3420_v42  ;;  %v1791_v14 = vpack.c.bf16 %v1777_v29, %v1776_v36  ;;  %2798 = vmatpush3.bf16.msra.mxu1 %v2873_v16  ;;  %v2874_v25 = vld [vmem:[#allocation14 + $0x8] sm:$0xff]   ;;  %v2417_v26 = vld [vmem:[#allocation11 + $0x1] ss:$0 sm:$0xff] }
 0x8c5   :  { %v2746_v28 = vpop.f32.mrf.mxu1  ;;  %2799 = vmatprep.subr.bf16.mxu1 %v2874_v25 }
 0x8c6   :  { %1764 = vst [vmem:[#allocation16 + $0x30] sm:$0xff] %v1748_v7  ;;  %v1746_v32 = vadd.f32 %v4156_v24, %v1725_v31  ;;  %v1728_v38 = vmul.f32 %v2746_v28, %v3430_v48  ;;  %v1790_v21 = vpack.c.bf16 %v1775_v45, %v1774_v10  ;;  %v1780_v33 = vmax.f32 %v1748_v7, 0.0 }
 0x8c7   :  { %v1677_v27 = vpop.f32.mrf.mxu1 }
 0x8c8   :  { %1762 = vst [vmem:[#allocation16 + $0x20] sm:$0xff] %v1746_v32  ;;  %v1749_v49 = vadd.f32 %v4156_v24, %v1728_v38  ;;  %v1726_v1 = vmul.f32 %v1677_v27, %v3418_v41  ;;  %2771 = vmatprep.mubr.bf16.mxu0 %v1790_v21  ;;  %v1778_v46 = vmax.f32 %v1746_v32, 0.0  ;;  %2800 = vmatpush3.bf16.msra.mxu1 %v2874_v25 }
 0x8c9   :  { %v2749_v18 = vpop.f32.mrf.mxu1  ;;  %2772 = vmatmul.mubr.bf16.vlgmr.msra.gmra.mxu0 %v1791_v14 }
 0x8ca   :  { %1765 = vst [vmem:[#allocation16 + $0x38] sm:$0xff] %v1749_v49  ;;  %v1747_v42 = vadd.f32 %v4156_v24, %v1726_v1  ;;  %v1731_v19 = vmul.f32 %v2749_v18, %v3456_v63  ;;  %v1781_v59 = vmax.f32 %v1749_v49, 0.0 }
 0x8cb   :  { %v1690_v39 = vpop.f32.mrf.mxu1 }
 0x8cc   :  { %1763 = vst [vmem:[#allocation16 + $0x28] sm:$0xff] %v1747_v42  ;;  %v1779_v48 = vmax.f32 %v1747_v42, 0.0  ;;  %v1752_v22 = vadd.f32 %v4156_v24, %v1731_v19  ;;  %v1729_v23 = vmul.f32 %v1690_v39, %v3444_v56  ;;  %v1793_v47 = vpack.c.bf16 %v1781_v59, %v1780_v33 }
 0x8cd   :  { %v2750_v30 = vpop.f32.mrf.mxu1 }
 0x8ce   :  { %1768 = vst [vmem:[#allocation16 + $0x50] sm:$0xff] %v1752_v22  ;;  %v1750_v41 = vadd.f32 %v4156_v24, %v1729_v23  ;;  %v1732_v8 = vmul.f32 %v2750_v30, %v3454_v62  ;;  %v1792_v37 = vpack.c.bf16 %v1779_v48, %v1778_v46  ;;  %v1784_v61 = vmax.f32 %v1752_v22, 0.0 }
 0x8cf   :  { %v1693_v43 = vpop.f32.mrf.mxu1 }
 0x8d0   :  { %1766 = vst [vmem:[#allocation16 + $0x40] sm:$0xff] %v1750_v41  ;;  %v1753_v63 = vadd.f32 %v4156_v24, %v1732_v8  ;;  %v1730_v51 = vmul.f32 %v1693_v43, %v3442_v55  ;;  %2775 = vmatprep.mubr.bf16.mxu0 %v1792_v37  ;;  %v1782_v57 = vmax.f32 %v1750_v41, 0.0 }
 0x8d1   :  { %v2753_v50 = vpop.f32.mrf.mxu1  ;;  %2776 = vmatmul.mubr.bf16.gmra.mxu0 %v1793_v47 }
 0x8d2   :  { %1769 = vst [vmem:[#allocation16 + $0x58] sm:$0xff] %v1753_v63  ;;  %v1751_v56 = vadd.f32 %v4156_v24, %v1730_v51  ;;  %v1735_v9 = vmul.f32 %v2753_v50, %v3480_v13  ;;  %v1785_v52 = vmax.f32 %v1753_v63, 0.0 }
 0x8d3   :  { %v1706_v53 = vpop.f32.mrf.mxu1 }
 0x8d4   :  { %1767 = vst [vmem:[#allocation16 + $0x48] sm:$0xff] %v1751_v56  ;;  %v1783_v62 = vmax.f32 %v1751_v56, 0.0  ;;  %v1756_v58 = vadd.f32 %v4156_v24, %v1735_v9  ;;  %v1733_v60 = vmul.f32 %v1706_v53, %v3468_v6  ;;  %v1795_v35 = vpack.c.bf16 %v1785_v52, %v1784_v61 }
 0x8d5   :  { %v2754_v0 = vpop.f32.mrf.mxu1 }
 0x8d6   :  { %1772 = vst [vmem:[#allocation16 + $0x70] sm:$0xff] %v1756_v58  ;;  %v1754_v55 = vadd.f32 %v4156_v24, %v1733_v60  ;;  %v1736_v20 = vmul.f32 %v2754_v0, %v3478_v12  ;;  %v1794_v3 = vpack.c.bf16 %v1783_v62, %v1782_v57  ;;  %v1788_v2 = vmax.f32 %v1756_v58, 0.0  ;;  %v2426_v62 = vld [vmem:[#allocation11 + $0x2] ss:$0 sm:$0xff] }
 0x8d7   :  { %v1709_v40 = vpop.f32.mrf.mxu1 }
 0x8d8   :  { %1770 = vst [vmem:[#allocation16 + $0x60] sm:$0xff] %v1754_v55  ;;  %v1757_v13 = vadd.f32 %v4156_v24, %v1736_v20  ;;  %v1734_v15 = vmul.f32 %v1709_v40, %v3466_v5  ;;  %2779 = vmatprep.mubr.bf16.mxu0 %v1794_v3  ;;  %v1786_v34 = vmax.f32 %v1754_v55, 0.0  ;;  %v2875_v5 = vld [vmem:[#allocation14] sm:$0xff]  }
 0x8d9   :  { %2780 = vmatmul.mubr.bf16.gmra.mxu0 %v1795_v35  ;;  %2801 = vmatprep.subr.bf16.mxu1 %v2875_v5 }
 0x8da   :  { %1773 = vst [vmem:[#allocation16 + $0x78] sm:$0xff] %v1757_v13  ;;  %v1755_v6 = vadd.f32 %v4156_v24, %v1734_v15  ;;  %v1789_v44 = vmax.f32 %v1757_v13, 0.0  ;;  %2802 = vmatpush3.bf16.msra.mxu1 %v2875_v5 }
 0x8dc   :  { %1771 = vst [vmem:[#allocation16 + $0x68] sm:$0xff] %v1755_v6  ;;  %v1787_v11 = vmax.f32 %v1755_v6, 0.0  ;;  %v1797_v12 = vpack.c.bf16 %v1789_v44, %v1788_v2 }
 0x8de   :  { %v1796_v54 = vpack.c.bf16 %v1787_v11, %v1786_v34 }
 0x8e0   :  { %2783 = vmatprep.mubr.bf16.mxu0 %v1796_v54 }
 0x8e1   :  { %2784 = vmatmul.mubr.bf16.gmra.mxu0 %v1797_v12 }
 0x989   :  { %v2773_v4 = vpop.f32.mrf.mxu0 }
 0x98a   :  { %v1910_v36 = vadd.f32 %v2773_v4, %v2417_v26 }
 0x98b   :  { %v1901_v24 = vpop.f32.mrf.mxu0 }
 0x98c   :  { %v1902_v7 = vadd.f32 %v2417_v26, %v1901_v24 }
 0x98d   :  { %v2774_v29 = vpop.f32.mrf.mxu0 }
 0x98e   :  { %v1913_v10 = vadd.f32 %v2774_v29, %v2417_v26 }
 0x98f   :  { %v1904_v45 = vpop.f32.mrf.mxu0 }
 0x990   :  { %v1905_v31 = vadd.f32 %v2417_v26, %v1904_v45  ;;  %v1965_v38 = vpack.c.bf16 %v1913_v10, %v1910_v36 }
 0x991   :  { %v2777_v28 = vpop.f32.mrf.mxu0 }
 0x992   :  { %v1964_v32 = vpack.c.bf16 %v1905_v31, %v1902_v7  ;;  %v1926_v42 = vadd.f32 %v2777_v28, %v2417_v26 }
 0x993   :  { %v1917_v21 = vpop.f32.mrf.mxu0 }
 0x994   :  { %2803 = vmatprep.mubr.bf16.mxu1 %v1964_v32  ;;  %v1918_v1 = vadd.f32 %v2417_v26, %v1917_v21 }
 0x995   :  { %v2778_v14 = vpop.f32.mrf.mxu0  ;;  %2804 = vmatmul.mubr.bf16.vlgmr.msra.gmra.mxu1 %v1965_v38 }
 0x996   :  { %v1929_v27 = vadd.f32 %v2778_v14, %v2417_v26 }
 0x997   :  { %v1920_v49 = vpop.f32.mrf.mxu0 }
 0x998   :  { %v1921_v18 = vadd.f32 %v2417_v26, %v1920_v49  ;;  %v1967_v39 = vpack.c.bf16 %v1929_v27, %v1926_v42 }
 0x999   :  { %v2781_v19 = vpop.f32.mrf.mxu0 }
 0x99a   :  { %v1966_v59 = vpack.c.bf16 %v1921_v18, %v1918_v1  ;;  %v1942_v41 = vadd.f32 %v2781_v19, %v2417_v26 }
 0x99b   :  { %v1933_v46 = vpop.f32.mrf.mxu0 }
 0x99c   :  { %2807 = vmatprep.mubr.bf16.mxu1 %v1966_v59  ;;  %v1934_v33 = vadd.f32 %v2417_v26, %v1933_v46 }
 0x99d   :  { %v2782_v48 = vpop.f32.mrf.mxu0  ;;  %2808 = vmatmul.mubr.bf16.gmra.mxu1 %v1967_v39 }
 0x99e   :  { %v1945_v22 = vadd.f32 %v2782_v48, %v2417_v26 }
 0x99f   :  { %v1936_v23 = vpop.f32.mrf.mxu0 }
 0x9a0   :  { %v1937_v30 = vadd.f32 %v2417_v26, %v1936_v23  ;;  %v1969_v43 = vpack.c.bf16 %v1945_v22, %v1942_v41 }
 0x9a1   :  { %v2785_v8 = vpop.f32.mrf.mxu0 }
 0x9a2   :  { %v1968_v37 = vpack.c.bf16 %v1937_v30, %v1934_v33  ;;  %v1958_v52 = vadd.f32 %v2785_v8, %v2417_v26 }
 0x9a3   :  { %v1949_v47 = vpop.f32.mrf.mxu0 }
 0x9a4   :  { %2811 = vmatprep.mubr.bf16.mxu1 %v1968_v37  ;;  %v1950_v56 = vadd.f32 %v2417_v26, %v1949_v47 }
 0x9a5   :  { %v2786_v63 = vpop.f32.mrf.mxu0  ;;  %2812 = vmatmul.mubr.bf16.gmra.mxu1 %v1969_v43 }
 0x9a6   :  { %v1961_v51 = vadd.f32 %v2786_v63, %v2417_v26 }
 0x9a7   :  { %v1952_v50 = vpop.f32.mrf.mxu0 }
 0x9a8   :  { %v1953_v9 = vadd.f32 %v2417_v26, %v1952_v50  ;;  %v1971_v57 = vpack.c.bf16 %v1961_v51, %v1958_v52 }
 0x9aa   :  { %v1970_v53 = vpack.c.bf16 %v1953_v9, %v1950_v56 }
 0x9ac   :  { %2815 = vmatprep.mubr.bf16.mxu1 %v1970_v53 }
 0x9ad   :  { %2816 = vmatmul.mubr.bf16.gmra.mxu1 %v1971_v57 }
 0xa55   :  { %v2805_v58 = vpop.f32.mrf.mxu1 }
 0xa56   :  { %v2084_v60 = vadd.f32 %v2805_v58, %v2426_v62 }
 0xa57   :  { %v2075_v61 = vpop.f32.mrf.mxu1 }
 0xa58   :  { %v2076_v0 = vadd.f32 %v2426_v62, %v2075_v61  ;;  %v2143_v55 = vsel %vm2138_vm1, %v2084_v60, -1e+30 }
 0xa59   :  { %2161 = vmax.xlane.f32.xlu1 %v2143_v55  ;;  %v2806_v20 = vpop.f32.mrf.mxu1 }
 0xa5a   :  { %v2087_v3 = vadd.f32 %v2806_v20, %v2426_v62  ;;  %v2141_v15 = vsel %vm2138_vm1, %v2076_v0, -1e+30 }
 0xa5b   :  { %v2078_v40 = vpop.f32.mrf.mxu1 }
 0xa5c   :  { %v2079_v35 = vadd.f32 %v2426_v62, %v2078_v40  ;;  %v2144_v13 = vsel %vm2138_vm1, %v2087_v3, -1e+30 }
 0xa5d   :  { %2163 = vmax.xlane.f32.xlu0 %v2144_v13  ;;  %v2809_v6 = vpop.f32.mrf.mxu1  ;;  %2157 = vmax.xlane.f32.xlu1 %v2141_v15 }
 0xa5e   :  { %v2100_v44 = vadd.f32 %v2809_v6, %v2426_v62  ;;  %v2142_v2 = vsel %vm2138_vm1, %v2079_v35, -1e+30 }
 0xa5f   :  { %v2091_v34 = vpop.f32.mrf.mxu1 }
 0xa60   :  { %v2092_v11 = vadd.f32 %v2426_v62, %v2091_v34  ;;  %v2147_v54 = vsel %vm2138_vm1, %v2100_v44, -1e+30 }
 0xa61   :  { %v2810_v12 = vpop.f32.mrf.mxu1  ;;  %2159 = vmax.xlane.f32.xlu0 %v2142_v2  ;;  %2169 = vmax.xlane.f32.xlu1 %v2147_v54 }
 0xa62   :  { %v2103_v16 = vadd.f32 %v2810_v12, %v2426_v62  ;;  %v2145_v24 = vsel %vm2138_vm1, %v2092_v11, -1e+30 }
 0xa63   :  { %v2094_v25 = vpop.f32.mrf.mxu1 }
 0xa64   :  { %v2095_v5 = vadd.f32 %v2426_v62, %v2094_v25  ;;  %v2148_v4 = vsel %vm2138_vm1, %v2103_v16, -1e+30 }
 0xa65   :  { %v2813_v29 = vpop.f32.mrf.mxu1  ;;  %2171 = vmax.xlane.f32.xlu0 %v2148_v4  ;;  %2165 = vmax.xlane.f32.xlu1 %v2145_v24 }
 0xa66   :  { %v2116_v26 = vadd.f32 %v2813_v29, %v2426_v62  ;;  %v2146_v7 = vsel %vm2138_vm1, %v2095_v5, -1e+30 }
 0xa67   :  { %v2107_v10 = vpop.f32.mrf.mxu1 }
 0xa68   :  { %v2108_v45 = vadd.f32 %v2426_v62, %v2107_v10  ;;  %v2151_v31 = vsel %vm2138_vm1, %v2116_v26, -1e+30 }
 0xa69   :  { %v2814_v36 = vpop.f32.mrf.mxu1  ;;  %2167 = vmax.xlane.f32.xlu0 %v2146_v7  ;;  %2177 = vmax.xlane.f32.xlu1 %v2151_v31 }
 0xa6a   :  { %v2119_v28 = vadd.f32 %v2814_v36, %v2426_v62  ;;  %v2149_v14 = vsel %vm2138_vm1, %v2108_v45, -1e+30 }
 0xa6b   :  { %v2110_v32 = vpop.f32.mrf.mxu1 }
 0xa6c   :  { %v2111_v38 = vadd.f32 %v2426_v62, %v2110_v32  ;;  %v2152_v21 = vsel %vm2138_vm1, %v2119_v28, -1e+30 }
 0xa6d   :  { %2179 = vmax.xlane.f32.xlu0 %v2152_v21  ;;  %2173 = vmax.xlane.f32.xlu1 %v2149_v14  ;;  %v2817_v27 = vpop.f32.mrf.mxu1 }
 0xa6e   :  { %v4215_v18 = vsel %vm2138_vm1, %v2111_v38, -1e+30  ;;  %v2132_v19 = vadd.f32 %v2817_v27, %v2426_v62 }
 0xa6f   :  { %v2123_v49 = vpop.f32.mrf.mxu1 }
 0xa70   :  { %v2124_v1 = vadd.f32 %v2426_v62, %v2123_v49  ;;  %v4229_v23 = vsel %vm2138_vm1, %v2132_v19, -1e+30 }
 0xa71   :  { %2175 = vmax.xlane.f32.xlu0 %v4215_v18  ;;  %v2818_v42 = vpop.f32.mrf.mxu1 }
 0xa72   :  { %v4220_v59 = vsel %vm2138_vm1, %v2124_v1, -1e+30  ;;  %v2135_v48 = vadd.f32 %v2818_v42, %v2426_v62 }
 0xa73   :  { %v2126_v39 = vpop.f32.mrf.mxu1  ;;  %2181 = vmax.xlane.f32.xlu1 %v4220_v59 }
 0xa74   :  { %v2127_v46 = vadd.f32 %v2426_v62, %v2126_v39  ;;  %v4235_v33 = vsel %vm2138_vm1, %v2135_v48, -1e+30 }
 0xa76   :  { %v4225_v22 = vsel %vm2138_vm1, %v2127_v46, -1e+30 }
 0xa77   :  { %2183 = vmax.xlane.f32.xlu0 %v4225_v22  ;;  %2185 = vmax.xlane.f32.xlu1 %v4229_v23 }
 0xa7b   :  { %2187 = vmax.xlane.f32.xlu0 %v4235_v33 }
 0xae2   :  { %v2162_v30 = vpop.xlane.xlu1 %2161 }
 0xae3   :  { %v4238_v41 = vsub.f32 %v2143_v55, %v2162_v30 }
 0xae5   :  { %v2209_v8 = vmul.f32 1.442695, %v4238_v41 }
 0xae6   :  { %v2164_v37 = vpop.xlane.xlu0 %2163  ;;  %v2158_v43 = vpop.xlane.xlu1 %2157 }
 0xae7   :  { %2940 = vpow2.f32 %v2209_v8  ;;  %v4241_v47 = vsub.f32 %v2144_v13, %v2164_v37  ;;  %v4243_v63 = vsub.f32 %v2141_v15, %v2158_v43 }
 0xae9   :  { %v2211_v51 = vmul.f32 1.442695, %v4241_v47  ;;  %v2205_v50 = vmul.f32 1.442695, %v4243_v63 }
 0xaea   :  { %v2160_v56 = vpop.xlane.xlu0 %2159  ;;  %v2170_v9 = vpop.xlane.xlu1 %2169 }
 0xaeb   :  { %2942 = vpow2.f32 %v2211_v51  ;;  %v4247_v52 = vsub.f32 %v2142_v2, %v2160_v56  ;;  %v4249_v53 = vsub.f32 %v2147_v54, %v2170_v9 }
 0xaec   :  { %2944 = vpow2.f32 %v2205_v50 }
 0xaed   :  { %v2207_v57 = vmul.f32 1.442695, %v4247_v52  ;;  %v2217_v62 = vmul.f32 1.442695, %v4249_v53 }
 0xaee   :  { %v2172_v58 = vpop.xlane.xlu0 %2171  ;;  %v2166_v60 = vpop.xlane.xlu1 %2165 }
 0xaef   :  { %2946 = vpow2.f32 %v2207_v57  ;;  %v4253_v61 = vsub.f32 %v2148_v4, %v2172_v58  ;;  %v4255_v0 = vsub.f32 %v2145_v24, %v2166_v60 }
 0xaf0   :  { %2948 = vpow2.f32 %v2217_v62 }
 0xaf1   :  { %v2219_v55 = vmul.f32 1.442695, %v4253_v61  ;;  %v2213_v20 = vmul.f32 1.442695, %v4255_v0 }
 0xaf2   :  { %v2168_v3 = vpop.xlane.xlu0 %2167  ;;  %v2178_v40 = vpop.xlane.xlu1 %2177 }
 0xaf3   :  { %2950 = vpow2.f32 %v2219_v55  ;;  %v4259_v35 = vsub.f32 %v2146_v7, %v2168_v3  ;;  %v4261_v13 = vsub.f32 %v2151_v31, %v2178_v40 }
 0xaf4   :  { %v2941_v15 = vpop.eup %2940  ;;  %2952 = vpow2.f32 %v2213_v20 }
 0xaf5   :  { %v2215_v6 = vmul.f32 1.442695, %v4259_v35  ;;  %v2225_v44 = vmul.f32 1.442695, %v4261_v13  ;;  %v2239_v34 = vsel %vm2138_vm1, %v2941_v15, 0.0 }
 0xaf6   :  { %v2180_v11 = vpop.xlane.xlu0 %2179  ;;  %v2174_v2 = vpop.xlane.xlu1 %2173  ;;  %2257 = vadd.xlane.f32.xlu1 %v2239_v34 }
 0xaf7   :  { %2954 = vpow2.f32 %v2215_v6  ;;  %v4267_v54 = vsub.f32 %v2152_v21, %v2180_v11  ;;  %v4269_v12 = vsub.f32 %v2149_v14, %v2174_v2 }
 0xaf8   :  { %v2943_v16 = vpop.eup %2942  ;;  %2956 = vpow2.f32 %v2225_v44 }
 0xaf9   :  { %v2945_v25 = vpop.eup %2944  ;;  %v2227_v5 = vmul.f32 1.442695, %v4267_v54  ;;  %v2221_v4 = vmul.f32 1.442695, %v4269_v12  ;;  %v2240_v24 = vsel %vm2138_vm1, %v2943_v16, 0.0 }
 0xafa   :  { %v2176_v29 = vpop.xlane.xlu0 %2175  ;;  %2259 = vadd.xlane.f32.xlu0 %v2240_v24  ;;  %v2237_v26 = vsel %vm2138_vm1, %v2945_v25, 0.0 }
 0xafb   :  { %2958 = vpow2.f32 %v2227_v5  ;;  %v4278_v10 = vsub.f32 %v4215_v18, %v2176_v29  ;;  %2253 = vadd.xlane.f32.xlu1 %v2237_v26 }
 0xafc   :  { %v2947_v45 = vpop.eup %2946  ;;  %2960 = vpow2.f32 %v2221_v4  ;;  %v2182_v7 = vpop.xlane.xlu1 %2181 }
 0xafd   :  { %v2949_v31 = vpop.eup %2948  ;;  %v2223_v36 = vmul.f32 1.442695, %v4278_v10  ;;  %v4282_v28 = vsub.f32 %v4220_v59, %v2182_v7  ;;  %v2238_v32 = vsel %vm2138_vm1, %v2947_v45, 0.0 }
 0xafe   :  { %2255 = vadd.xlane.f32.xlu0 %v2238_v32  ;;  %v2243_v38 = vsel %vm2138_vm1, %v2949_v31, 0.0 }
 0xaff   :  { %2962 = vpow2.f32 %v2223_v36  ;;  %v2229_v21 = vmul.f32 1.442695, %v4282_v28  ;;  %2265 = vadd.xlane.f32.xlu1 %v2243_v38 }
 0xb00   :  { %v2951_v14 = vpop.eup %2950  ;;  %v2184_v27 = vpop.xlane.xlu0 %2183 }
 0xb01   :  { %v2186_v49 = vpop.xlane.xlu1 %2185  ;;  %v2953_v1 = vpop.eup %2952  ;;  %2964 = vpow2.f32 %v2229_v21  ;;  %v4290_v18 = vsub.f32 %v4225_v22, %v2184_v27  ;;  %v2244_v19 = vsel %vm2138_vm1, %v2951_v14, 0.0 }
 0xb02   :  { %v4293_v42 = vsub.f32 %v4229_v23, %v2186_v49  ;;  %2267 = vadd.xlane.f32.xlu0 %v2244_v19  ;;  %v2241_v59 = vsel %vm2138_vm1, %v2953_v1, 0.0 }
 0xb03   :  { %v2231_v39 = vmul.f32 1.442695, %v4290_v18  ;;  %2261 = vadd.xlane.f32.xlu1 %v2241_v59 }
 0xb04   :  { %v2233_v46 = vmul.f32 1.442695, %v4293_v42  ;;  %v2955_v48 = vpop.eup %2954  ;;  %v2188_v30 = vpop.xlane.xlu0 %2187 }
 0xb05   :  { %v2957_v8 = vpop.eup %2956  ;;  %2966 = vpow2.f32 %v2231_v39  ;;  %v4302_v22 = vsub.f32 %v4235_v33, %v2188_v30  ;;  %v2242_v23 = vsel %vm2138_vm1, %v2955_v48, 0.0 }
 0xb06   :  { %2968 = vpow2.f32 %v2233_v46  ;;  %2263 = vadd.xlane.f32.xlu0 %v2242_v23  ;;  %v2247_v37 = vsel %vm2138_vm1, %v2957_v8, 0.0 }
 0xb07   :  { %v2235_v43 = vmul.f32 1.442695, %v4302_v22  ;;  %2273 = vadd.xlane.f32.xlu1 %v2247_v37 }
 0xb08   :  { %v2959_v51 = vpop.eup %2958 }
 0xb09   :  { %v2961_v50 = vpop.eup %2960  ;;  %2970 = vpow2.f32 %v2235_v43  ;;  %v2248_v56 = vsel %vm2138_vm1, %v2959_v51, 0.0 }
 0xb0a   :  { %2275 = vadd.xlane.f32.xlu0 %v2248_v56  ;;  %v2245_v33 = vsel %vm2138_vm1, %v2961_v50, 0.0 }
 0xb0b   :  { %2269 = vadd.xlane.f32.xlu1 %v2245_v33 }
 0xb0c   :  { %v2963_v9 = vpop.eup %2962 }
 0xb0d   :  { %v2246_v57 = vsel %vm2138_vm1, %v2963_v9, 0.0 }
 0xb0e   :  { %v2965_v62 = vpop.eup %2964  ;;  %2271 = vadd.xlane.f32.xlu0 %v2246_v57 }
 0xb0f   :  { %v2249_v58 = vsel %vm2138_vm1, %v2965_v62, 0.0 }
 0xb10   :  { %2277 = vadd.xlane.f32.xlu1 %v2249_v58 }
 0xb12   :  { %v2967_v60 = vpop.eup %2966 }
 0xb13   :  { %v2969_v55 = vpop.eup %2968  ;;  %v2250_v20 = vsel %vm2138_vm1, %v2967_v60, 0.0 }
 0xb14   :  { %2279 = vadd.xlane.f32.xlu0 %v2250_v20  ;;  %v2251_v3 = vsel %vm2138_vm1, %v2969_v55, 0.0 }
 0xb15   :  { %2281 = vadd.xlane.f32.xlu1 %v2251_v3 }
 0xb16   :  { %v2971_v40 = vpop.eup %2970 }
 0xb17   :  { %v2252_v15 = vsel %vm2138_vm1, %v2971_v40, 0.0 }
 0xb18   :  { %2283 = vadd.xlane.f32.xlu0 %v2252_v15 }
 0xb19   :  { %3175 = shalt.err (!%p3172_p2)
}
 0xb1a   :  { %2360 = dma.vmem_to_hbm [thread:$0]  %s2355_s4, 2048, %s4362_s11, [#allocation4], %s3224_s5, %s3224_s5, %s3225_s22  }
 0xb1b   :  { %s3232_s11 = smov [#allocation17]  }
 0xb1c   :  { %s2366_s26 = sshll.u32 %s3232_s11, 4  ;;  %s2367_s26 = int_to_ptr.vmem [resolvable:$true] %s2366_s26 }
 0xb1d   :  { %s3184_s9 = scalar_lea.vmem %s2367_s26, 2048  ;;  %p3189_p4 = scmp.lt.s32.totalorder %s2367_s26, %s2367_s26 }
 0xb1e   :  { %p3185_p3 = scmp.ne.s32.totalorder %s2367_s26, %s3184_s9  ;;  %p3190_p5 = scmp.lt.s32.totalorder %s3184_s9, %s3184_s9 }
 0xb20   :  { %p3191_p6 = por %p3190_p5, %p3189_p4 }
 0xb22   :  { %p3192_p7 = pnand %p3191_p6, %p3185_p3 }
 0xb7f   :  { %v2258_v17 = vpop.xlane.xlu1 %2257 }
 0xb80   :  { %2972 = vlog2.f32 %v2258_v17 }
 0xb83   :  { %v2260_v6 = vpop.xlane.xlu0 %2259 }
 0xb84   :  { %2974 = vlog2.f32 %v2260_v6  ;;  %v2254_v44 = vpop.xlane.xlu1 %2253 }
 0xb85   :  { %2976 = vlog2.f32 %v2254_v44 }
 0xb87   :  { %v2256_v34 = vpop.xlane.xlu0 %2255 }
 0xb88   :  { %2978 = vlog2.f32 %v2256_v34  ;;  %v2266_v11 = vpop.xlane.xlu1 %2265 }
 0xb89   :  { %2980 = vlog2.f32 %v2266_v11 }
 0xb8b   :  { %v2268_v2 = vpop.xlane.xlu0 %2267 }
 0xb8c   :  { %2982 = vlog2.f32 %v2268_v2  ;;  %v2262_v16 = vpop.xlane.xlu1 %2261 }
 0xb8d   :  { %v2973_v25 = vpop.eup %2972  ;;  %2984 = vlog2.f32 %v2262_v16 }
 0xb8e   :  { %v2290_v5 = vmul.f32 0.6931472, %v2973_v25 }
 0xb8f   :  { %v2264_v4 = vpop.xlane.xlu0 %2263 }
 0xb90   :  { %v2319_v24 = vsub.f32 %v4238_v41, %v2290_v5  ;;  %2986 = vlog2.f32 %v2264_v4  ;;  %v2274_v29 = vpop.xlane.xlu1 %2273 }
 0xb91   :  { %v2975_v26 = vpop.eup %2974  ;;  %2988 = vlog2.f32 %v2274_v29 }
 0xb92   :  { %v2977_v45 = vpop.eup %2976  ;;  %2335 = vst [vmem:[#allocation17 + $0x10] sm:$0xff] %v2319_v24  ;;  %v2292_v7 = vmul.f32 0.6931472, %v2975_v26 }
 0xb93   :  { %v2286_v31 = vmul.f32 0.6931472, %v2977_v45  ;;  %v2276_v36 = vpop.xlane.xlu0 %2275 }
 0xb94   :  { %v2320_v32 = vsub.f32 %v4241_v47, %v2292_v7  ;;  %2990 = vlog2.f32 %v2276_v36  ;;  %v2270_v38 = vpop.xlane.xlu1 %2269 }
 0xb95   :  { %v2979_v21 = vpop.eup %2978  ;;  %v2317_v14 = vsub.f32 %v4243_v63, %v2286_v31  ;;  %2992 = vlog2.f32 %v2270_v38 }
 0xb96   :  { %v2981_v27 = vpop.eup %2980  ;;  %2336 = vst [vmem:[#allocation17 + $0x18] sm:$0xff] %v2320_v32  ;;  %v2288_v41 = vmul.f32 0.6931472, %v2979_v21 }
 0xb97   :  { %2333 = vst [vmem:[#allocation17] sm:$0xff] %v2317_v14  ;;  %v2298_v49 = vmul.f32 0.6931472, %v2981_v27  ;;  %v2272_v1 = vpop.xlane.xlu0 %2271 }
 0xb98   :  { %v2318_v19 = vsub.f32 %v4247_v52, %v2288_v41  ;;  %2994 = vlog2.f32 %v2272_v1 }
 0xb99   :  { %v2983_v59 = vpop.eup %2982  ;;  %v2323_v39 = vsub.f32 %v4249_v53, %v2298_v49  ;;  %v2278_v46 = vpop.xlane.xlu1 %2277 }
 0xb9a   :  { %v2985_v47 = vpop.eup %2984  ;;  %2334 = vst [vmem:[#allocation17 + $0x8] sm:$0xff] %v2318_v19  ;;  %v2300_v48 = vmul.f32 0.6931472, %v2983_v59  ;;  %2996 = vlog2.f32 %v2278_v46 }
 0xb9b   :  { %2339 = vst [vmem:[#allocation17 + $0x30] sm:$0xff] %v2323_v39  ;;  %v2294_v63 = vmul.f32 0.6931472, %v2985_v47 }
 0xb9c   :  { %v2324_v30 = vsub.f32 %v4253_v61, %v2300_v48 }
 0xb9d   :  { %v2987_v8 = vpop.eup %2986  ;;  %v2321_v23 = vsub.f32 %v4255_v0, %v2294_v63  ;;  %v2280_v37 = vpop.xlane.xlu0 %2279 }
 0xb9e   :  { %v2989_v43 = vpop.eup %2988  ;;  %2340 = vst [vmem:[#allocation17 + $0x38] sm:$0xff] %v2324_v30  ;;  %v2296_v52 = vmul.f32 0.6931472, %v2987_v8  ;;  %2998 = vlog2.f32 %v2280_v37  ;;  %v2282_v51 = vpop.xlane.xlu1 %2281 }
 0xb9f   :  { %2337 = vst [vmem:[#allocation17 + $0x20] sm:$0xff] %v2321_v23  ;;  %v2306_v53 = vmul.f32 0.6931472, %v2989_v43  ;;  %3000 = vlog2.f32 %v2282_v51 }
 0xba0   :  { %v2322_v50 = vsub.f32 %v4259_v35, %v2296_v52 }
 0xba1   :  { %v2991_v56 = vpop.eup %2990  ;;  %v2327_v33 = vsub.f32 %v4261_v13, %v2306_v53  ;;  %v2284_v9 = vpop.xlane.xlu0 %2283 }
 0xba2   :  { %v2993_v57 = vpop.eup %2992  ;;  %2338 = vst [vmem:[#allocation17 + $0x28] sm:$0xff] %v2322_v50  ;;  %v2308_v61 = vmul.f32 0.6931472, %v2991_v56  ;;  %3002 = vlog2.f32 %v2284_v9 }
 0xba3   :  { %2343 = vst [vmem:[#allocation17 + $0x50] sm:$0xff] %v2327_v33  ;;  %v2302_v0 = vmul.f32 0.6931472, %v2993_v57 }
 0xba4   :  { %v2328_v62 = vsub.f32 %v4267_v54, %v2308_v61 }
 0xba5   :  { %v2995_v58 = vpop.eup %2994  ;;  %v2325_v60 = vsub.f32 %v4269_v12, %v2302_v0 }
 0xba6   :  { %2344 = vst [vmem:[#allocation17 + $0x58] sm:$0xff] %v2328_v62  ;;  %v2304_v55 = vmul.f32 0.6931472, %v2995_v58 }
 0xba7   :  { %v2997_v20 = vpop.eup %2996  ;;  %2341 = vst [vmem:[#allocation17 + $0x40] sm:$0xff] %v2325_v60 }
 0xba8   :  { %v2326_v35 = vsub.f32 %v4278_v10, %v2304_v55  ;;  %v2310_v3 = vmul.f32 0.6931472, %v2997_v20 }
 0xbaa   :  { %2342 = vst [vmem:[#allocation17 + $0x48] sm:$0xff] %v2326_v35  ;;  %v2329_v13 = vsub.f32 %v4282_v28, %v2310_v3 }
 0xbab   :  { %v2999_v40 = vpop.eup %2998 }
 0xbac   :  { %v3001_v15 = vpop.eup %3000  ;;  %2345 = vst [vmem:[#allocation17 + $0x60] sm:$0xff] %v2329_v13  ;;  %v2312_v17 = vmul.f32 0.6931472, %v2999_v40 }
 0xbad   :  { %v2314_v6 = vmul.f32 0.6931472, %v3001_v15 }
 0xbae   :  { %v2330_v54 = vsub.f32 %v4290_v18, %v2312_v17 }
 0xbaf   :  { %v3003_v44 = vpop.eup %3002  ;;  %v2331_v12 = vsub.f32 %v4293_v42, %v2314_v6 }
 0xbb0   :  { %2346 = vst [vmem:[#allocation17 + $0x68] sm:$0xff] %v2330_v54  ;;  %v2316_v34 = vmul.f32 0.6931472, %v3003_v44 }
 0xbb1   :  { %2347 = vst [vmem:[#allocation17 + $0x70] sm:$0xff] %v2331_v12 }
 0xbb2   :  { %v2332_v10 = vsub.f32 %v4302_v22, %v2316_v34 }
 0xbb4   :  { %2348 = vst [vmem:[#allocation17 + $0x78] sm:$0xff] %v2332_v10 }
 0xbb5   :  { %3195 = shalt.err (!%p3192_p7)
}
 0xbb6   :  { %2372 = dma.vmem_to_hbm [thread:$0]  %s2367_s26, 2048, %s4363_s12, [#allocation18], %s3224_s5, %s3224_s5, %s3225_s22  }
 0xbb7   :  { %3214 = dma.done.wait [#allocation4], 2048  }
 0xbb8   :  { %3215 = vsyncadd [#allocation4], 4294965248 }
 0xbb9   :  { %3216 = dma.done.wait [#allocation18], 2048  }
 0xbba   :  { %3217 = vsyncadd [#allocation18], 4294965248 }
 0xbbb   :  { %2379 = vsyncpa [#allocation3], 1 }
 0xbbc   :  { %2380 = vsyncpa [#allocation6], 1 }
 0xbbd   :  { %2381 = vsyncpa [#allocation9], 1 }
 0xbbe   :  { %2382 = vsyncpa [#allocation12], 1 }
 0xbbf   :  { %2383 = vsyncpa [#allocation15], 1 }
 0xbc0   :  { %2384 = vsyncpa [#allocation4], 1 }
 0xbc1   :  { %2385 = vsyncpa [#allocation18], 1 }

</bundles_post_ra>
